<compile_context>
chip_gen: v6e
topology: v6e:2x2x1
jax: 0.10.0
libtpu: 0.0.40
codegen_flags: <defaults>
</compile_context>

<pallas_src>
import functools
import math

import jax
import jax.numpy as jnp
import numpy as np
from jax.experimental import pallas as pl
from jax.experimental.pallas import tpu as pltpu


# ------------------------- in-kernel helpers -------------------------------

def _rmsnorm(x, w, eps=1e-8):
    # PyTorch RMSNorm: norm = ||x||_2 * (1/sqrt(D)); y = w * x / (norm + eps)
    nrm = jnp.sqrt(jnp.sum(x * x, axis=-1, keepdims=True)) * (
        1.0 / math.sqrt(x.shape[-1])
    )
    return w * x / (nrm + eps)


def _gelu_exact(x):
    # nn.GELU() default = exact erf GELU.
    return 0.5 * x * (1.0 + jax.lax.erf(x * (1.0 / math.sqrt(2.0))))


# ------------------------------ kernel --------------------------------------

def fused_transformer_kernel(
    x_ref, qe_ref, ke_ref,
    wq_ref, bq_ref, wk_ref, bk_ref, wv_ref, bv_ref, wo_ref, bo_ref,
    n1_ref, n2_ref, w1_ref, b1_ref, w2_ref, b2_ref,
    out_ref,
    o_scratch,                      # (N, D) bf16 VMEM: per-head outputs
    *, num_heads, ffn_chunk,
):
    layer = pl.program_id(1)

    # Layer 0: seed the VMEM-resident carry (output block) with the input.
    @pl.when(layer == 0)
    def _():
        out_ref[...] = x_ref[...]

    bb, F_tok, D = out_ref.shape
    N = bb * F_tok
    hd = D // num_heads
    f32 = jnp.float32
    bf16 = jnp.bfloat16

    # Flatten batch into rows (leading-dim merge only; layout preserved).
    x = out_ref[...].reshape(N, D)          # carry from previous layer (f32)
    qe = qe_ref[...].reshape(N, D)
    ke = ke_ref[...].reshape(N, D)

    # --- Q/K/V projections: bf16 MXU, f32 accumulation.
    # 1/sqrt(hd) already folded into wq / bq on the host.
    Q = jnp.dot(qe.astype(bf16), wq_ref[0], preferred_element_type=f32) + bq_ref[0]
    K = jnp.dot(ke.astype(bf16), wk_ref[0], preferred_element_type=f32) + bk_ref[0]
    V = jnp.dot(x.astype(bf16), wv_ref[0], preferred_element_type=f32) + bv_ref[0]

    Q3 = Q.astype(bf16).reshape(bb, F_tok, D)
    K3 = K.astype(bf16).reshape(bb, F_tok, D)
    V3 = V.astype(bf16).reshape(bb, F_tok, D)

    # --- multi-head attention: static head loop; each head writes its output
    # into a lane slice of o_scratch, then ONE K=D matmul applies W_o.
    for h in range(num_heads):
        lo, hi = h * hd, (h + 1) * hd
        qh = Q3[:, :, lo:hi]                    # (bb, F, hd) bf16
        kh = K3[:, :, lo:hi]
        vh = V3[:, :, lo:hi]
        s = jnp.einsum("bqd,bkd->bqk", qh, kh, preferred_element_type=f32)
        m = jnp.max(s, axis=-1, keepdims=True)
        p = jnp.exp(s - m)
        denom = jnp.sum(p, axis=-1, keepdims=True)
        w = (p * pl.reciprocal(denom, approx=True)).astype(bf16)   # EUP slot
        o = jnp.einsum("bqk,bkd->bqd", w, vh, preferred_element_type=f32)
        o_scratch[:, lo:hi] = o.reshape(N, hd).astype(o_scratch.dtype)

    attn_out = (jnp.dot(o_scratch[...], wo_ref[0], preferred_element_type=f32)
                + bo_ref[0])

    # --- residual + RMSNorm 1 (f32 VPU path) ---
    x1 = _rmsnorm(x + attn_out, n1_ref[0])
    x1b = x1.astype(bf16)

    # --- feed-forward, chunked over the 4*D hidden dim (no (N, 4D) intermediate)
    hidden = w1_ref.shape[-1]
    ff = None
    for lo in range(0, hidden, ffn_chunk):
        hi = min(lo + ffn_chunk, hidden)
        h1 = _gelu_exact(
            jnp.dot(x1b, w1_ref[0, :, lo:hi], preferred_element_type=f32)
            + b1_ref[0, :, lo:hi])
        contrib = jnp.dot(h1.astype(bf16), w2_ref[0, lo:hi, :],
                          preferred_element_type=f32)
        ff = contrib if ff is None else ff + contrib
    ff = ff + b2_ref[0]

    # --- residual + RMSNorm 2; result is the carry for the next layer ---
    out_ref[...] = _rmsnorm(x1 + ff, n2_ref[0]).reshape(bb, F_tok, D)


# ---------------------------- wrapper ----------------------------------------

def xai_guided_transformer(x, qexpl, kexpl, fl, fu, age, gender,
                           layer_params, num_heads,
                           *, batch_block=1, ffn_chunk=512,
                           weight_dtype=jnp.bfloat16):
    # fl, fu, age, gender are unused when drofe_fn is None (module default).
    # TODO(synk): drofe_fn is an externally supplied callable (None by default)
    # and therefore not implemented.
    del fl, fu, age, gender

    B, F_tok, D = x.shape
    num_layers = len(layer_params)
    hd = D // num_heads
    scale = 1.0 / math.sqrt(hd)
    assert B % batch_block == 0
    bb = batch_block

    MATMUL_W = (0, 2, 4, 6, 10, 12)         # wq, wk, wv, wo, w1, w2 -> bf16

    # Stack per-layer params along a leading layer axis; fold the attention
    # scale into W_q / b_q once on the host (zero per-step cost).
    stacked = []
    for i in range(len(layer_params[0])):
        arrs = [jnp.asarray(p[i], jnp.float32) for p in layer_params]
        if i in (0, 1):                      # wq, bq
            arrs = [a * scale for a in arrs]
        if arrs[0].ndim == 1:                # biases / norm weights as (1, out)
            arrs = [a.reshape(1, -1) for a in arrs]
        a = jnp.stack(arrs, axis=0)
        if i in MATMUL_W:
            a = a.astype(weight_dtype)
        stacked.append(a)

    tok_spec = pl.BlockSpec((bb, F_tok, D), lambda b, l: (b, 0, 0))
    param_specs = [
        pl.BlockSpec((1,) + s.shape[1:], lambda b, l: (l, 0, 0)) for s in stacked
    ]

    # VMEM budget from the actual block footprint: double-buffered token and
    # weight blocks + bf16 head-output scratch + margin (clamped to a sane range).
    tok_bytes = 4 * bb * F_tok * D * 4               # x, qe, ke inputs + out carry
    par_bytes = sum(int(np.prod(s.shape[1:])) * s.dtype.itemsize for s in stacked)
    scr_bytes = bb * F_tok * D * 2
    footprint = 2 * (tok_bytes + par_bytes) + scr_bytes + (2 << 20)
    vmem_limit = int(min(max(footprint, 32 << 20), 100 << 20))

    kern = functools.partial(fused_transformer_kernel,
                             num_heads=num_heads, ffn_chunk=ffn_chunk)
    return pl.pallas_call(
        kern,
        out_shape=jax.ShapeDtypeStruct((B, F_tok, D), jnp.float32),
        grid_spec=pltpu.PrefetchScalarGridSpec(
            num_scalar_prefetch=0,
            grid=(B // bb, num_layers),      # (parallel batch tiles, layers)
            in_specs=[tok_spec, tok_spec, tok_spec] + param_specs,
            out_specs=tok_spec,
            scratch_shapes=[pltpu.VMEM((bb * F_tok, D), jnp.bfloat16)],
        ),
        compiler_params=pltpu.CompilerParams(
            # Layer axis carries the activation -> "arbitrary" and innermost.
            # Batch axis is "parallel" (v7x megacore gets independent tiles;
            # weights are re-fetched per tile, acceptable per review).
            dimension_semantics=("parallel", "arbitrary"),
            vmem_limit_bytes=vmem_limit,
        ),
    )(x, qexpl, kexpl, *stacked)


# ---------------------- pure-JAX reference (for sanity) ----------------------

def _ref_block(x, qe, ke, params, num_heads):
    (wq, bq, wk, bk, wv, bv, wo, bo, n1, n2, w1, b1, w2, b2) = params
    B, F_tok, D = x.shape
    hd = D // num_heads

    Q = qe @ wq + bq
    K = ke @ wk + bk
    V = x @ wv + bv

    def split(t):  # (B, F, D) -> (B, H, F, hd)
        return t.reshape(B, F_tok, num_heads, hd).transpose(0, 2, 1, 3)

    Qh, Kh, Vh = split(Q), split(K), split(V)
    s = jnp.einsum("bhqd,bhkd->bhqk", Qh, Kh) / math.sqrt(hd)
    w = jax.nn.softmax(s, axis=-1)
    o = jnp.einsum("bhqk,bhkd->bhqd", w, Vh)
    o = o.transpose(0, 2, 1, 3).reshape(B, F_tok, D)
    attn_out = o @ wo + bo

    def rms(t, g, eps=1e-8):
        n = jnp.linalg.norm(t, axis=-1, keepdims=True) * (1.0 / math.sqrt(D))
        return g * t / (n + eps)

    x1 = rms(x + attn_out, n1)
    ff = jax.nn.gelu(x1 @ w1 + b1, approximate=False) @ w2 + b2
    return rms(x1 + ff, n2)


def _ref_model(x, qe, ke, layer_params, num_heads):
    for p in layer_params:
        x = _ref_block(x, qe, ke, p, num_heads)
    return x


# ------------------------------- main ----------------------------------------

def _init_layer_params(key, dim):
    ks = jax.random.split(key, 8)
    dtype = jnp.float32

    def lin(k, fan_in, fan_out):
        bound = 1.0 / math.sqrt(fan_in)
        kw, kb = jax.random.split(k)
        w = jax.random.uniform(kw, (fan_in, fan_out), dtype, -bound, bound)
        b = jax.random.uniform(kb, (1, fan_out), dtype, -bound, bound)
        return w, b

    wq, bq = lin(ks[0], dim, dim)
    wk, bk = lin(ks[1], dim, dim)
    wv, bv = lin(ks[2], dim, dim)
    wo, bo = lin(ks[3], dim, dim)
    n1 = jnp.ones((1, dim), dtype)
    n2 = jnp.ones((1, dim), dtype)
    w1, b1 = lin(ks[4], dim, 4 * dim)
    w2, b2 = lin(ks[5], 4 * dim, dim)
    return [wq, bq, wk, bk, wv, bv, wo, bo, n1, n2, w1, b1, w2, b2]


if __name__ == "__main__":
    B, F_TOK, DIM, HEADS, LAYERS = 2, 8, 32, 4, 2

    root = jax.random.PRNGKey(0)
    k_x, k_q, k_k, k_p = jax.random.split(root, 4)

    x = jax.random.normal(k_x, (B, F_TOK, DIM), jnp.float32)
    qexpl = jax.random.normal(k_q, (B, F_TOK, DIM), jnp.float32)
    kexpl = jax.random.normal(k_k, (B, F_TOK, DIM), jnp.float32)

    # Unused auxiliary inputs (drofe_fn is None, as in the module default).
    fl = jnp.zeros((B,), jnp.float32)
    fu = jnp.ones((B,), jnp.float32)
    age = jnp.full((B,), 30.0, jnp.float32)
    gender = jnp.zeros((B,), jnp.float32)

    layer_keys = jax.random.split(k_p, LAYERS)
    layer_params = [_init_layer_params(k, DIM) for k in layer_keys]

    out = xai_guided_transformer(
        x, qexpl, kexpl, fl, fu, age, gender, layer_params, HEADS
    )
    out = jax.block_until_ready(out)

    ref = jax.block_until_ready(_ref_model(x, qexpl, kexpl, layer_params, HEADS))

    # Kernel matmuls run in bf16 on the MXU (per perf review); tolerance is
    # loosened vs the pure-f32 reference accordingly.
    np.testing.assert_allclose(np.asarray(out), np.asarray(ref),
                               rtol=5e-2, atol=8e-2)

    print("KERNEL_OK")
</pallas_src>

<mosaic_0001>
module attributes {stable_mosaic.version = 11 : i64} {
  func.func @fused_transformer_kernel(%arg0: i32, %arg1: i32, %arg2: memref<1x8x32xf32, #tpu.memory_space<vmem>>, %arg3: memref<1x8x32xf32, #tpu.memory_space<vmem>>, %arg4: memref<1x8x32xf32, #tpu.memory_space<vmem>>, %arg5: memref<1x32x32xbf16, #tpu.memory_space<vmem>>, %arg6: memref<1x1x32xf32, #tpu.memory_space<vmem>>, %arg7: memref<1x32x32xbf16, #tpu.memory_space<vmem>>, %arg8: memref<1x1x32xf32, #tpu.memory_space<vmem>>, %arg9: memref<1x32x32xbf16, #tpu.memory_space<vmem>>, %arg10: memref<1x1x32xf32, #tpu.memory_space<vmem>>, %arg11: memref<1x32x32xbf16, #tpu.memory_space<vmem>>, %arg12: memref<1x1x32xf32, #tpu.memory_space<vmem>>, %arg13: memref<1x1x32xf32, #tpu.memory_space<vmem>>, %arg14: memref<1x1x32xf32, #tpu.memory_space<vmem>>, %arg15: memref<1x32x128xbf16, #tpu.memory_space<vmem>>, %arg16: memref<1x1x128xf32, #tpu.memory_space<vmem>>, %arg17: memref<1x128x32xbf16, #tpu.memory_space<vmem>>, %arg18: memref<1x1x32xf32, #tpu.memory_space<vmem>>, %arg19: memref<1x8x32xf32, #tpu.memory_space<vmem>>, %arg20: memref<8x32xbf16, #tpu.memory_space<vmem>>) attributes {dimension_semantics = [#tpu.dimension_semantics<parallel>, #tpu.dimension_semantics<arbitrary>], iteration_bounds = array<i64: 2, 2>, scalar_prefetch = 0 : i64, scratch_operands = 1 : i64, tpu.core_type = #tpu.core_type<tc>, window_params = [{transform_indices = @transform_0, window_bounds = array<i64: 1, 8, 32>}, {transform_indices = @transform_1, window_bounds = array<i64: 1, 8, 32>}, {transform_indices = @transform_2, window_bounds = array<i64: 1, 8, 32>}, {transform_indices = @transform_3, window_bounds = array<i64: 1, 32, 32>}, {transform_indices = @transform_4, window_bounds = array<i64: 1, 1, 32>}, {transform_indices = @transform_5, window_bounds = array<i64: 1, 32, 32>}, {transform_indices = @transform_6, window_bounds = array<i64: 1, 1, 32>}, {transform_indices = @transform_7, window_bounds = array<i64: 1, 32, 32>}, {transform_indices = @transform_8, window_bounds = array<i64: 1, 1, 32>}, {transform_indices = @transform_9, window_bounds = array<i64: 1, 32, 32>}, {transform_indices = @transform_10, window_bounds = array<i64: 1, 1, 32>}, {transform_indices = @transform_11, window_bounds = array<i64: 1, 1, 32>}, {transform_indices = @transform_12, window_bounds = array<i64: 1, 1, 32>}, {transform_indices = @transform_13, window_bounds = array<i64: 1, 32, 128>}, {transform_indices = @transform_14, window_bounds = array<i64: 1, 1, 128>}, {transform_indices = @transform_15, window_bounds = array<i64: 1, 128, 32>}, {transform_indices = @transform_16, window_bounds = array<i64: 1, 1, 32>}, {transform_indices = @transform_17, window_bounds = array<i64: 1, 8, 32>}]} {
    %c0_i32 = arith.constant 0 : i32
    %0 = arith.cmpi eq, %arg1, %c0_i32 : i32
    %1 = arith.extui %0 : i1 to i32
    %c0_i32_0 = arith.constant 0 : i32
    %2 = arith.cmpi ne, %1, %c0_i32_0 : i32
    scf.if %2 {
      %c0_91 = arith.constant 0 : index
      %c0_92 = arith.constant 0 : index
      %c0_93 = arith.constant 0 : index
      %179 = vector.load %arg2[%c0_91, %c0_92, %c0_93] : memref<1x8x32xf32, #tpu.memory_space<vmem>>, vector<1x8x32xf32>
      %c0_94 = arith.constant 0 : index
      %c0_95 = arith.constant 0 : index
      %c0_96 = arith.constant 0 : index
      %180 = vector.load %arg19[%c0_94, %c0_95, %c0_96] : memref<1x8x32xf32, #tpu.memory_space<vmem>>, vector<1x8x32xf32>
      tpu.vector_store %arg19[%c0_94, %c0_95, %c0_96], %179 {strides = array<i32>} : memref<1x8x32xf32, #tpu.memory_space<vmem>>, vector<1x8x32xf32>,
    } else {
    }
    %c0 = arith.constant 0 : index
    %c0_1 = arith.constant 0 : index
    %c0_2 = arith.constant 0 : index
    %3 = vector.load %arg19[%c0, %c0_1, %c0_2] : memref<1x8x32xf32, #tpu.memory_space<vmem>>, vector<1x8x32xf32>
    %4 = vector.shape_cast %3 : vector<1x8x32xf32> to vector<8x32xf32>
    %c0_3 = arith.constant 0 : index
    %c0_4 = arith.constant 0 : index
    %c0_5 = arith.constant 0 : index
    %5 = vector.load %arg3[%c0_3, %c0_4, %c0_5] : memref<1x8x32xf32, #tpu.memory_space<vmem>>, vector<1x8x32xf32>
    %6 = vector.shape_cast %5 : vector<1x8x32xf32> to vector<8x32xf32>
    %c0_6 = arith.constant 0 : index
    %c0_7 = arith.constant 0 : index
    %c0_8 = arith.constant 0 : index
    %7 = vector.load %arg4[%c0_6, %c0_7, %c0_8] : memref<1x8x32xf32, #tpu.memory_space<vmem>>, vector<1x8x32xf32>
    %8 = vector.shape_cast %7 : vector<1x8x32xf32> to vector<8x32xf32>
    %9 = arith.truncf %6 : vector<8x32xf32> to vector<8x32xbf16>
    %c0_9 = arith.constant 0 : index
    %c0_10 = arith.constant 0 : index
    %c0_11 = arith.constant 0 : index
    %10 = vector.load %arg5[%c0_9, %c0_10, %c0_11] : memref<1x32x32xbf16, #tpu.memory_space<vmem>>, vector<1x32x32xbf16>
    %11 = vector.shape_cast %10 : vector<1x32x32xbf16> to vector<32x32xbf16>
    %cst = arith.constant dense<0.000000e+00> : vector<8x32xf32>
    %12 = tpu.matmul %9, %11, %cst {dimension_numbers = #tpu.dot_dimension_numbers<[1], [0], [0], [1], [0, 0, 1, 1], [], []>} : vector<8x32xbf16>, vector<32x32xbf16>, vector<8x32xf32> -> vector<8x32xf32>
    %c0_12 = arith.constant 0 : index
    %c0_13 = arith.constant 0 : index
    %c0_14 = arith.constant 0 : index
    %13 = vector.load %arg6[%c0_12, %c0_13, %c0_14] : memref<1x1x32xf32, #tpu.memory_space<vmem>>, vector<1x1x32xf32>
    %14 = vector.shape_cast %13 : vector<1x1x32xf32> to vector<1x32xf32>
    %15 = vector.broadcast %14 : vector<1x32xf32> to vector<8x32xf32>
    %16 = arith.addf %12, %15 : vector<8x32xf32>
    %17 = arith.truncf %8 : vector<8x32xf32> to vector<8x32xbf16>
    %c0_15 = arith.constant 0 : index
    %c0_16 = arith.constant 0 : index
    %c0_17 = arith.constant 0 : index
    %18 = vector.load %arg7[%c0_15, %c0_16, %c0_17] : memref<1x32x32xbf16, #tpu.memory_space<vmem>>, vector<1x32x32xbf16>
    %19 = vector.shape_cast %18 : vector<1x32x32xbf16> to vector<32x32xbf16>
    %cst_18 = arith.constant dense<0.000000e+00> : vector<8x32xf32>
    %20 = tpu.matmul %17, %19, %cst_18 {dimension_numbers = #tpu.dot_dimension_numbers<[1], [0], [0], [1], [0, 0, 1, 1], [], []>} : vector<8x32xbf16>, vector<32x32xbf16>, vector<8x32xf32> -> vector<8x32xf32>
    %c0_19 = arith.constant 0 : index
    %c0_20 = arith.constant 0 : index
    %c0_21 = arith.constant 0 : index
    %21 = vector.load %arg8[%c0_19, %c0_20, %c0_21] : memref<1x1x32xf32, #tpu.memory_space<vmem>>, vector<1x1x32xf32>
    %22 = vector.shape_cast %21 : vector<1x1x32xf32> to vector<1x32xf32>
    %23 = vector.broadcast %22 : vector<1x32xf32> to vector<8x32xf32>
    %24 = arith.addf %20, %23 : vector<8x32xf32>
    %25 = arith.truncf %4 : vector<8x32xf32> to vector<8x32xbf16>
    %c0_22 = arith.constant 0 : index
    %c0_23 = arith.constant 0 : index
    %c0_24 = arith.constant 0 : index
    %26 = vector.load %arg9[%c0_22, %c0_23, %c0_24] : memref<1x32x32xbf16, #tpu.memory_space<vmem>>, vector<1x32x32xbf16>
    %27 = vector.shape_cast %26 : vector<1x32x32xbf16> to vector<32x32xbf16>
    %cst_25 = arith.constant dense<0.000000e+00> : vector<8x32xf32>
    %28 = tpu.matmul %25, %27, %cst_25 {dimension_numbers = #tpu.dot_dimension_numbers<[1], [0], [0], [1], [0, 0, 1, 1], [], []>} : vector<8x32xbf16>, vector<32x32xbf16>, vector<8x32xf32> -> vector<8x32xf32>
    %c0_26 = arith.constant 0 : index
    %c0_27 = arith.constant 0 : index
    %c0_28 = arith.constant 0 : index
    %29 = vector.load %arg10[%c0_26, %c0_27, %c0_28] : memref<1x1x32xf32, #tpu.memory_space<vmem>>, vector<1x1x32xf32>
    %30 = vector.shape_cast %29 : vector<1x1x32xf32> to vector<1x32xf32>
    %31 = vector.broadcast %30 : vector<1x32xf32> to vector<8x32xf32>
    %32 = arith.addf %28, %31 : vector<8x32xf32>
    %33 = arith.truncf %16 : vector<8x32xf32> to vector<8x32xbf16>
    %34 = vector.shape_cast %33 : vector<8x32xbf16> to vector<1x8x32xbf16>
    %35 = arith.truncf %24 : vector<8x32xf32> to vector<8x32xbf16>
    %36 = vector.shape_cast %35 : vector<8x32xbf16> to vector<1x8x32xbf16>
    %37 = arith.truncf %32 : vector<8x32xf32> to vector<8x32xbf16>
    %38 = vector.shape_cast %37 : vector<8x32xbf16> to vector<1x8x32xbf16>
    %39 = vector.extract_strided_slice %34 {offsets = [0, 0, 0], sizes = [1, 8, 8], strides = [1, 1, 1]} : vector<1x8x32xbf16> to vector<1x8x8xbf16>
    %40 = vector.extract_strided_slice %36 {offsets = [0, 0, 0], sizes = [1, 8, 8], strides = [1, 1, 1]} : vector<1x8x32xbf16> to vector<1x8x8xbf16>
    %41 = vector.extract_strided_slice %38 {offsets = [0, 0, 0], sizes = [1, 8, 8], strides = [1, 1, 1]} : vector<1x8x32xbf16> to vector<1x8x8xbf16>
    "tpu.trace_start"() <{level = 10 : i32, message = "bqd,bkd->bqk"}> : () -> ()
    %cst_29 = arith.constant dense<0.000000e+00> : vector<1x8x8xf32>
    %42 = tpu.matmul %39, %40, %cst_29 {dimension_numbers = #tpu.dot_dimension_numbers<[2], [2], [1], [1], [0, 0, 0, 1, 1, 1], [0], [0]>} : vector<1x8x8xbf16>, vector<1x8x8xbf16>, vector<1x8x8xf32> -> vector<1x8x8xf32>
    "tpu.trace_stop"() : () -> ()
    %cst_30 = arith.constant dense<0xFF800000> : vector<1x8xf32>
    %43 = vector.multi_reduction <maximumf>, %42, %cst_30 [2] : vector<1x8x8xf32> to vector<1x8xf32>
    %44 = vector.shape_cast %43 : vector<1x8xf32> to vector<1x8x1xf32>
    %45 = vector.broadcast %44 : vector<1x8x1xf32> to vector<1x8x8xf32>
    %46 = arith.subf %42, %45 : vector<1x8x8xf32>
    %47 = math.exp %46 : vector<1x8x8xf32>
    %cst_31 = arith.constant dense<0.000000e+00> : vector<1x8xf32>
    %48 = vector.multi_reduction <add>, %47, %cst_31 [2] : vector<1x8x8xf32> to vector<1x8xf32>
    %49 = vector.shape_cast %48 : vector<1x8xf32> to vector<1x8x1xf32>
    %50 = tpu.reciprocal %49 {approx = true} : vector<1x8x1xf32> -> vector<1x8x1xf32>
    %51 = vector.broadcast %50 : vector<1x8x1xf32> to vector<1x8x8xf32>
    %52 = arith.mulf %47, %51 : vector<1x8x8xf32>
    %53 = arith.truncf %52 : vector<1x8x8xf32> to vector<1x8x8xbf16>
    "tpu.trace_start"() <{level = 10 : i32, message = "bqk,bkd->bqd"}> : () -> ()
    %cst_32 = arith.constant dense<0.000000e+00> : vector<1x8x8xf32>
    %54 = tpu.matmul %53, %41, %cst_32 {dimension_numbers = #tpu.dot_dimension_numbers<[2], [1], [1], [2], [0, 0, 0, 1, 1, 2], [0], [0]>} : vector<1x8x8xbf16>, vector<1x8x8xbf16>, vector<1x8x8xf32> -> vector<1x8x8xf32>
    "tpu.trace_stop"() : () -> ()
    %55 = vector.shape_cast %54 : vector<1x8x8xf32> to vector<8x8xf32>
    %56 = arith.truncf %55 : vector<8x8xf32> to vector<8x8xbf16>
    %c0_33 = arith.constant 0 : index
    %c0_34 = arith.constant 0 : index
    %57 = vector.load %arg20[%c0_33, %c0_34] : memref<8x32xbf16, #tpu.memory_space<vmem>>, vector<8x8xbf16>
    tpu.vector_store %arg20[%c0_33, %c0_34], %56 {strides = array<i32>} : memref<8x32xbf16, #tpu.memory_space<vmem>>, vector<8x8xbf16>,
    %58 = vector.extract_strided_slice %34 {offsets = [0, 0, 8], sizes = [1, 8, 8], strides = [1, 1, 1]} : vector<1x8x32xbf16> to vector<1x8x8xbf16>
    %59 = vector.extract_strided_slice %36 {offsets = [0, 0, 8], sizes = [1, 8, 8], strides = [1, 1, 1]} : vector<1x8x32xbf16> to vector<1x8x8xbf16>
    %60 = vector.extract_strided_slice %38 {offsets = [0, 0, 8], sizes = [1, 8, 8], strides = [1, 1, 1]} : vector<1x8x32xbf16> to vector<1x8x8xbf16>
    "tpu.trace_start"() <{level = 10 : i32, message = "bqd,bkd->bqk"}> : () -> ()
    %cst_35 = arith.constant dense<0.000000e+00> : vector<1x8x8xf32>
    %61 = tpu.matmul %58, %59, %cst_35 {dimension_numbers = #tpu.dot_dimension_numbers<[2], [2], [1], [1], [0, 0, 0, 1, 1, 1], [0], [0]>} : vector<1x8x8xbf16>, vector<1x8x8xbf16>, vector<1x8x8xf32> -> vector<1x8x8xf32>
    "tpu.trace_stop"() : () -> ()
    %cst_36 = arith.constant dense<0xFF800000> : vector<1x8xf32>
    %62 = vector.multi_reduction <maximumf>, %61, %cst_36 [2] : vector<1x8x8xf32> to vector<1x8xf32>
    %63 = vector.shape_cast %62 : vector<1x8xf32> to vector<1x8x1xf32>
    %64 = vector.broadcast %63 : vector<1x8x1xf32> to vector<1x8x8xf32>
    %65 = arith.subf %61, %64 : vector<1x8x8xf32>
    %66 = math.exp %65 : vector<1x8x8xf32>
    %cst_37 = arith.constant dense<0.000000e+00> : vector<1x8xf32>
    %67 = vector.multi_reduction <add>, %66, %cst_37 [2] : vector<1x8x8xf32> to vector<1x8xf32>
    %68 = vector.shape_cast %67 : vector<1x8xf32> to vector<1x8x1xf32>
    %69 = tpu.reciprocal %68 {approx = true} : vector<1x8x1xf32> -> vector<1x8x1xf32>
    %70 = vector.broadcast %69 : vector<1x8x1xf32> to vector<1x8x8xf32>
    %71 = arith.mulf %66, %70 : vector<1x8x8xf32>
    %72 = arith.truncf %71 : vector<1x8x8xf32> to vector<1x8x8xbf16>
    "tpu.trace_start"() <{level = 10 : i32, message = "bqk,bkd->bqd"}> : () -> ()
    %cst_38 = arith.constant dense<0.000000e+00> : vector<1x8x8xf32>
    %73 = tpu.matmul %72, %60, %cst_38 {dimension_numbers = #tpu.dot_dimension_numbers<[2], [1], [1], [2], [0, 0, 0, 1, 1, 2], [0], [0]>} : vector<1x8x8xbf16>, vector<1x8x8xbf16>, vector<1x8x8xf32> -> vector<1x8x8xf32>
    "tpu.trace_stop"() : () -> ()
    %74 = vector.shape_cast %73 : vector<1x8x8xf32> to vector<8x8xf32>
    %75 = arith.truncf %74 : vector<8x8xf32> to vector<8x8xbf16>
    %c0_39 = arith.constant 0 : index
    %c8 = arith.constant 8 : index
    %76 = vector.load %arg20[%c0_39, %c8] : memref<8x32xbf16, #tpu.memory_space<vmem>>, vector<8x8xbf16>
    tpu.vector_store %arg20[%c0_39, %c8], %75 {strides = array<i32>} : memref<8x32xbf16, #tpu.memory_space<vmem>>, vector<8x8xbf16>,
    %77 = vector.extract_strided_slice %34 {offsets = [0, 0, 16], sizes = [1, 8, 8], strides = [1, 1, 1]} : vector<1x8x32xbf16> to vector<1x8x8xbf16>
    %78 = vector.extract_strided_slice %36 {offsets = [0, 0, 16], sizes = [1, 8, 8], strides = [1, 1, 1]} : vector<1x8x32xbf16> to vector<1x8x8xbf16>
    %79 = vector.extract_strided_slice %38 {offsets = [0, 0, 16], sizes = [1, 8, 8], strides = [1, 1, 1]} : vector<1x8x32xbf16> to vector<1x8x8xbf16>
    "tpu.trace_start"() <{level = 10 : i32, message = "bqd,bkd->bqk"}> : () -> ()
    %cst_40 = arith.constant dense<0.000000e+00> : vector<1x8x8xf32>
    %80 = tpu.matmul %77, %78, %cst_40 {dimension_numbers = #tpu.dot_dimension_numbers<[2], [2], [1], [1], [0, 0, 0, 1, 1, 1], [0], [0]>} : vector<1x8x8xbf16>, vector<1x8x8xbf16>, vector<1x8x8xf32> -> vector<1x8x8xf32>
    "tpu.trace_stop"() : () -> ()
    %cst_41 = arith.constant dense<0xFF800000> : vector<1x8xf32>
    %81 = vector.multi_reduction <maximumf>, %80, %cst_41 [2] : vector<1x8x8xf32> to vector<1x8xf32>
    %82 = vector.shape_cast %81 : vector<1x8xf32> to vector<1x8x1xf32>
    %83 = vector.broadcast %82 : vector<1x8x1xf32> to vector<1x8x8xf32>
    %84 = arith.subf %80, %83 : vector<1x8x8xf32>
    %85 = math.exp %84 : vector<1x8x8xf32>
    %cst_42 = arith.constant dense<0.000000e+00> : vector<1x8xf32>
    %86 = vector.multi_reduction <add>, %85, %cst_42 [2] : vector<1x8x8xf32> to vector<1x8xf32>
    %87 = vector.shape_cast %86 : vector<1x8xf32> to vector<1x8x1xf32>
    %88 = tpu.reciprocal %87 {approx = true} : vector<1x8x1xf32> -> vector<1x8x1xf32>
    %89 = vector.broadcast %88 : vector<1x8x1xf32> to vector<1x8x8xf32>
    %90 = arith.mulf %85, %89 : vector<1x8x8xf32>
    %91 = arith.truncf %90 : vector<1x8x8xf32> to vector<1x8x8xbf16>
    "tpu.trace_start"() <{level = 10 : i32, message = "bqk,bkd->bqd"}> : () -> ()
    %cst_43 = arith.constant dense<0.000000e+00> : vector<1x8x8xf32>
    %92 = tpu.matmul %91, %79, %cst_43 {dimension_numbers = #tpu.dot_dimension_numbers<[2], [1], [1], [2], [0, 0, 0, 1, 1, 2], [0], [0]>} : vector<1x8x8xbf16>, vector<1x8x8xbf16>, vector<1x8x8xf32> -> vector<1x8x8xf32>
    "tpu.trace_stop"() : () -> ()
    %93 = vector.shape_cast %92 : vector<1x8x8xf32> to vector<8x8xf32>
    %94 = arith.truncf %93 : vector<8x8xf32> to vector<8x8xbf16>
    %c0_44 = arith.constant 0 : index
    %c16 = arith.constant 16 : index
    %95 = vector.load %arg20[%c0_44, %c16] : memref<8x32xbf16, #tpu.memory_space<vmem>>, vector<8x8xbf16>
    tpu.vector_store %arg20[%c0_44, %c16], %94 {strides = array<i32>} : memref<8x32xbf16, #tpu.memory_space<vmem>>, vector<8x8xbf16>,
    %96 = vector.extract_strided_slice %34 {offsets = [0, 0, 24], sizes = [1, 8, 8], strides = [1, 1, 1]} : vector<1x8x32xbf16> to vector<1x8x8xbf16>
    %97 = vector.extract_strided_slice %36 {offsets = [0, 0, 24], sizes = [1, 8, 8], strides = [1, 1, 1]} : vector<1x8x32xbf16> to vector<1x8x8xbf16>
    %98 = vector.extract_strided_slice %38 {offsets = [0, 0, 24], sizes = [1, 8, 8], strides = [1, 1, 1]} : vector<1x8x32xbf16> to vector<1x8x8xbf16>
    "tpu.trace_start"() <{level = 10 : i32, message = "bqd,bkd->bqk"}> : () -> ()
    %cst_45 = arith.constant dense<0.000000e+00> : vector<1x8x8xf32>
    %99 = tpu.matmul %96, %97, %cst_45 {dimension_numbers = #tpu.dot_dimension_numbers<[2], [2], [1], [1], [0, 0, 0, 1, 1, 1], [0], [0]>} : vector<1x8x8xbf16>, vector<1x8x8xbf16>, vector<1x8x8xf32> -> vector<1x8x8xf32>
    "tpu.trace_stop"() : () -> ()
    %cst_46 = arith.constant dense<0xFF800000> : vector<1x8xf32>
    %100 = vector.multi_reduction <maximumf>, %99, %cst_46 [2] : vector<1x8x8xf32> to vector<1x8xf32>
    %101 = vector.shape_cast %100 : vector<1x8xf32> to vector<1x8x1xf32>
    %102 = vector.broadcast %101 : vector<1x8x1xf32> to vector<1x8x8xf32>
    %103 = arith.subf %99, %102 : vector<1x8x8xf32>
    %104 = math.exp %103 : vector<1x8x8xf32>
    %cst_47 = arith.constant dense<0.000000e+00> : vector<1x8xf32>
    %105 = vector.multi_reduction <add>, %104, %cst_47 [2] : vector<1x8x8xf32> to vector<1x8xf32>
    %106 = vector.shape_cast %105 : vector<1x8xf32> to vector<1x8x1xf32>
    %107 = tpu.reciprocal %106 {approx = true} : vector<1x8x1xf32> -> vector<1x8x1xf32>
    %108 = vector.broadcast %107 : vector<1x8x1xf32> to vector<1x8x8xf32>
    %109 = arith.mulf %104, %108 : vector<1x8x8xf32>
    %110 = arith.truncf %109 : vector<1x8x8xf32> to vector<1x8x8xbf16>
    "tpu.trace_start"() <{level = 10 : i32, message = "bqk,bkd->bqd"}> : () -> ()
    %cst_48 = arith.constant dense<0.000000e+00> : vector<1x8x8xf32>
    %111 = tpu.matmul %110, %98, %cst_48 {dimension_numbers = #tpu.dot_dimension_numbers<[2], [1], [1], [2], [0, 0, 0, 1, 1, 2], [0], [0]>} : vector<1x8x8xbf16>, vector<1x8x8xbf16>, vector<1x8x8xf32> -> vector<1x8x8xf32>
    "tpu.trace_stop"() : () -> ()
    %112 = vector.shape_cast %111 : vector<1x8x8xf32> to vector<8x8xf32>
    %113 = arith.truncf %112 : vector<8x8xf32> to vector<8x8xbf16>
    %c0_49 = arith.constant 0 : index
    %c24 = arith.constant 24 : index
    %114 = vector.load %arg20[%c0_49, %c24] : memref<8x32xbf16, #tpu.memory_space<vmem>>, vector<8x8xbf16>
    tpu.vector_store %arg20[%c0_49, %c24], %113 {strides = array<i32>} : memref<8x32xbf16, #tpu.memory_space<vmem>>, vector<8x8xbf16>,
    %c0_50 = arith.constant 0 : index
    %c0_51 = arith.constant 0 : index
    %115 = vector.load %arg20[%c0_50, %c0_51] : memref<8x32xbf16, #tpu.memory_space<vmem>>, vector<8x32xbf16>
    %c0_52 = arith.constant 0 : index
    %c0_53 = arith.constant 0 : index
    %c0_54 = arith.constant 0 : index
    %116 = vector.load %arg11[%c0_52, %c0_53, %c0_54] : memref<1x32x32xbf16, #tpu.memory_space<vmem>>, vector<1x32x32xbf16>
    %117 = vector.shape_cast %116 : vector<1x32x32xbf16> to vector<32x32xbf16>
    %cst_55 = arith.constant dense<0.000000e+00> : vector<8x32xf32>
    %118 = tpu.matmul %115, %117, %cst_55 {dimension_numbers = #tpu.dot_dimension_numbers<[1], [0], [0], [1], [0, 0, 1, 1], [], []>} : vector<8x32xbf16>, vector<32x32xbf16>, vector<8x32xf32> -> vector<8x32xf32>
    %c0_56 = arith.constant 0 : index
    %c0_57 = arith.constant 0 : index
    %c0_58 = arith.constant 0 : index
    %119 = vector.load %arg12[%c0_56, %c0_57, %c0_58] : memref<1x1x32xf32, #tpu.memory_space<vmem>>, vector<1x1x32xf32>
    %120 = vector.shape_cast %119 : vector<1x1x32xf32> to vector<1x32xf32>
    %121 = vector.broadcast %120 : vector<1x32xf32> to vector<8x32xf32>
    %122 = arith.addf %118, %121 : vector<8x32xf32>
    %123 = arith.addf %4, %122 : vector<8x32xf32>
    %c0_59 = arith.constant 0 : index
    %c0_60 = arith.constant 0 : index
    %c0_61 = arith.constant 0 : index
    %124 = vector.load %arg13[%c0_59, %c0_60, %c0_61] : memref<1x1x32xf32, #tpu.memory_space<vmem>>, vector<1x1x32xf32>
    %125 = vector.shape_cast %124 : vector<1x1x32xf32> to vector<1x32xf32>
    %126 = arith.mulf %123, %123 : vector<8x32xf32>
    %cst_62 = arith.constant dense<0.000000e+00> : vector<8xf32>
    %127 = vector.multi_reduction <add>, %126, %cst_62 [1] : vector<8x32xf32> to vector<8xf32>
    %128 = vector.shape_cast %127 : vector<8xf32> to vector<8x1xf32>
    %129 = math.sqrt %128 : vector<8x1xf32>
    %cst_63 = arith.constant 0.176776692 : f32
    %130 = vector.broadcast %cst_63 : f32 to vector<8x1xf32>
    %131 = arith.mulf %129, %130 : vector<8x1xf32>
    %132 = vector.broadcast %125 : vector<1x32xf32> to vector<8x32xf32>
    %133 = arith.mulf %132, %123 : vector<8x32xf32>
    %cst_64 = arith.constant 9.99999993E-9 : f32
    %134 = vector.broadcast %cst_64 : f32 to vector<8x1xf32>
    %135 = arith.addf %131, %134 : vector<8x1xf32>
    %136 = vector.broadcast %135 : vector<8x1xf32> to vector<8x32xf32>
    %137 = arith.divf %133, %136 : vector<8x32xf32>
    %138 = arith.truncf %137 : vector<8x32xf32> to vector<8x32xbf16>
    %c0_65 = arith.constant 0 : index
    %c0_66 = arith.constant 0 : index
    %c0_67 = arith.constant 0 : index
    %139 = vector.load %arg15[%c0_65, %c0_66, %c0_67] : memref<1x32x128xbf16, #tpu.memory_space<vmem>>, vector<1x32x128xbf16>
    %140 = vector.shape_cast %139 : vector<1x32x128xbf16> to vector<32x128xbf16>
    %cst_68 = arith.constant dense<0.000000e+00> : vector<8x128xf32>
    %141 = tpu.matmul %138, %140, %cst_68 {dimension_numbers = #tpu.dot_dimension_numbers<[1], [0], [0], [1], [0, 0, 1, 1], [], []>} : vector<8x32xbf16>, vector<32x128xbf16>, vector<8x128xf32> -> vector<8x128xf32>
    %c0_69 = arith.constant 0 : index
    %c0_70 = arith.constant 0 : index
    %c0_71 = arith.constant 0 : index
    %142 = vector.load %arg16[%c0_69, %c0_70, %c0_71] : memref<1x1x128xf32, #tpu.memory_space<vmem>>, vector<1x1x128xf32>
    %143 = vector.shape_cast %142 : vector<1x1x128xf32> to vector<1x128xf32>
    %144 = vector.broadcast %143 : vector<1x128xf32> to vector<8x128xf32>
    %145 = arith.addf %141, %144 : vector<8x128xf32>
    %cst_72 = arith.constant 5.000000e-01 : f32
    %146 = vector.broadcast %cst_72 : f32 to vector<8x128xf32>
    %147 = arith.mulf %146, %145 : vector<8x128xf32>
    %cst_73 = arith.constant 0.707106769 : f32
    %148 = vector.broadcast %cst_73 : f32 to vector<8x128xf32>
    %149 = arith.mulf %145, %148 : vector<8x128xf32>
    %150 = math.erf %149 : vector<8x128xf32>
    %cst_74 = arith.constant 1.000000e+00 : f32
    %151 = vector.broadcast %cst_74 : f32 to vector<8x128xf32>
    %152 = arith.addf %151, %150 : vector<8x128xf32>
    %153 = arith.mulf %147, %152 : vector<8x128xf32>
    %154 = arith.truncf %153 : vector<8x128xf32> to vector<8x128xbf16>
    %c0_75 = arith.constant 0 : index
    %c0_76 = arith.constant 0 : index
    %c0_77 = arith.constant 0 : index
    %155 = vector.load %arg17[%c0_75, %c0_76, %c0_77] : memref<1x128x32xbf16, #tpu.memory_space<vmem>>, vector<1x128x32xbf16>
    %156 = vector.shape_cast %155 : vector<1x128x32xbf16> to vector<128x32xbf16>
    %cst_78 = arith.constant dense<0.000000e+00> : vector<8x32xf32>
    %157 = tpu.matmul %154, %156, %cst_78 {dimension_numbers = #tpu.dot_dimension_numbers<[1], [0], [0], [1], [0, 0, 1, 1], [], []>} : vector<8x128xbf16>, vector<128x32xbf16>, vector<8x32xf32> -> vector<8x32xf32>
    %c0_79 = arith.constant 0 : index
    %c0_80 = arith.constant 0 : index
    %c0_81 = arith.constant 0 : index
    %158 = vector.load %arg18[%c0_79, %c0_80, %c0_81] : memref<1x1x32xf32, #tpu.memory_space<vmem>>, vector<1x1x32xf32>
    %159 = vector.shape_cast %158 : vector<1x1x32xf32> to vector<1x32xf32>
    %160 = vector.broadcast %159 : vector<1x32xf32> to vector<8x32xf32>
    %161 = arith.addf %157, %160 : vector<8x32xf32>
    %162 = arith.addf %137, %161 : vector<8x32xf32>
    %c0_82 = arith.constant 0 : index
    %c0_83 = arith.constant 0 : index
    %c0_84 = arith.constant 0 : index
    %163 = vector.load %arg14[%c0_82, %c0_83, %c0_84] : memref<1x1x32xf32, #tpu.memory_space<vmem>>, vector<1x1x32xf32>
    %164 = vector.shape_cast %163 : vector<1x1x32xf32> to vector<1x32xf32>
    %165 = arith.mulf %162, %162 : vector<8x32xf32>
    %cst_85 = arith.constant dense<0.000000e+00> : vector<8xf32>
    %166 = vector.multi_reduction <add>, %165, %cst_85 [1] : vector<8x32xf32> to vector<8xf32>
    %167 = vector.shape_cast %166 : vector<8xf32> to vector<8x1xf32>
    %168 = math.sqrt %167 : vector<8x1xf32>
    %cst_86 = arith.constant 0.176776692 : f32
    %169 = vector.broadcast %cst_86 : f32 to vector<8x1xf32>
    %170 = arith.mulf %168, %169 : vector<8x1xf32>
    %171 = vector.broadcast %164 : vector<1x32xf32> to vector<8x32xf32>
    %172 = arith.mulf %171, %162 : vector<8x32xf32>
    %cst_87 = arith.constant 9.99999993E-9 : f32
    %173 = vector.broadcast %cst_87 : f32 to vector<8x1xf32>
    %174 = arith.addf %170, %173 : vector<8x1xf32>
    %175 = vector.broadcast %174 : vector<8x1xf32> to vector<8x32xf32>
    %176 = arith.divf %172, %175 : vector<8x32xf32>
    %177 = vector.shape_cast %176 : vector<8x32xf32> to vector<1x8x32xf32>
    %c0_88 = arith.constant 0 : index
    %c0_89 = arith.constant 0 : index
    %c0_90 = arith.constant 0 : index
    %178 = vector.load %arg19[%c0_88, %c0_89, %c0_90] : memref<1x8x32xf32, #tpu.memory_space<vmem>>, vector<1x8x32xf32>
    tpu.vector_store %arg19[%c0_88, %c0_89, %c0_90], %177 {strides = array<i32>} : memref<1x8x32xf32, #tpu.memory_space<vmem>>, vector<1x8x32xf32>,
    return
  }
  func.func @transform_0(%arg0: i32, %arg1: i32) -> (i32, i32, i32) {
    %c0_i32 = arith.constant 0 : i32
    %c0_i32_0 = arith.constant 0 : i32
    %c0_i32_1 = arith.constant 0 : i32
    return %arg0, %c0_i32, %c0_i32_0 : i32, i32, i32
  }
  func.func @transform_1(%arg0: i32, %arg1: i32) -> (i32, i32, i32) {
    %c0_i32 = arith.constant 0 : i32
    %c0_i32_0 = arith.constant 0 : i32
    %c0_i32_1 = arith.constant 0 : i32
    return %arg0, %c0_i32, %c0_i32_0 : i32, i32, i32
  }
  func.func @transform_2(%arg0: i32, %arg1: i32) -> (i32, i32, i32) {
    %c0_i32 = arith.constant 0 : i32
    %c0_i32_0 = arith.constant 0 : i32
    %c0_i32_1 = arith.constant 0 : i32
    return %arg0, %c0_i32, %c0_i32_0 : i32, i32, i32
  }
  func.func @transform_3(%arg0: i32, %arg1: i32) -> (i32, i32, i32) {
    %c0_i32 = arith.constant 0 : i32
    %c0_i32_0 = arith.constant 0 : i32
    %c0_i32_1 = arith.constant 0 : i32
    return %arg1, %c0_i32, %c0_i32_0 : i32, i32, i32
  }
  func.func @transform_4(%arg0: i32, %arg1: i32) -> (i32, i32, i32) {
    %c0_i32 = arith.constant 0 : i32
    %c0_i32_0 = arith.constant 0 : i32
    %c0_i32_1 = arith.constant 0 : i32
    return %arg1, %c0_i32, %c0_i32_0 : i32, i32, i32
  }
  func.func @transform_5(%arg0: i32, %arg1: i32) -> (i32, i32, i32) {
    %c0_i32 = arith.constant 0 : i32
    %c0_i32_0 = arith.constant 0 : i32
    %c0_i32_1 = arith.constant 0 : i32
    return %arg1, %c0_i32, %c0_i32_0 : i32, i32, i32
  }
  func.func @transform_6(%arg0: i32, %arg1: i32) -> (i32, i32, i32) {
    %c0_i32 = arith.constant 0 : i32
    %c0_i32_0 = arith.constant 0 : i32
    %c0_i32_1 = arith.constant 0 : i32
    return %arg1, %c0_i32, %c0_i32_0 : i32, i32, i32
  }
  func.func @transform_7(%arg0: i32, %arg1: i32) -> (i32, i32, i32) {
    %c0_i32 = arith.constant 0 : i32
    %c0_i32_0 = arith.constant 0 : i32
    %c0_i32_1 = arith.constant 0 : i32
    return %arg1, %c0_i32, %c0_i32_0 : i32, i32, i32
  }
  func.func @transform_8(%arg0: i32, %arg1: i32) -> (i32, i32, i32) {
    %c0_i32 = arith.constant 0 : i32
    %c0_i32_0 = arith.constant 0 : i32
    %c0_i32_1 = arith.constant 0 : i32
    return %arg1, %c0_i32, %c0_i32_0 : i32, i32, i32
  }
  func.func @transform_9(%arg0: i32, %arg1: i32) -> (i32, i32, i32) {
    %c0_i32 = arith.constant 0 : i32
    %c0_i32_0 = arith.constant 0 : i32
    %c0_i32_1 = arith.constant 0 : i32
    return %arg1, %c0_i32, %c0_i32_0 : i32, i32, i32
  }
  func.func @transform_10(%arg0: i32, %arg1: i32) -> (i32, i32, i32) {
    %c0_i32 = arith.constant 0 : i32
    %c0_i32_0 = arith.constant 0 : i32
    %c0_i32_1 = arith.constant 0 : i32
    return %arg1, %c0_i32, %c0_i32_0 : i32, i32, i32
  }
  func.func @transform_11(%arg0: i32, %arg1: i32) -> (i32, i32, i32) {
    %c0_i32 = arith.constant 0 : i32
    %c0_i32_0 = arith.constant 0 : i32
    %c0_i32_1 = arith.constant 0 : i32
    return %arg1, %c0_i32, %c0_i32_0 : i32, i32, i32
  }
  func.func @transform_12(%arg0: i32, %arg1: i32) -> (i32, i32, i32) {
    %c0_i32 = arith.constant 0 : i32
    %c0_i32_0 = arith.constant 0 : i32
    %c0_i32_1 = arith.constant 0 : i32
    return %arg1, %c0_i32, %c0_i32_0 : i32, i32, i32
  }
  func.func @transform_13(%arg0: i32, %arg1: i32) -> (i32, i32, i32) {
    %c0_i32 = arith.constant 0 : i32
    %c0_i32_0 = arith.constant 0 : i32
    %c0_i32_1 = arith.constant 0 : i32
    return %arg1, %c0_i32, %c0_i32_0 : i32, i32, i32
  }
  func.func @transform_14(%arg0: i32, %arg1: i32) -> (i32, i32, i32) {
    %c0_i32 = arith.constant 0 : i32
    %c0_i32_0 = arith.constant 0 : i32
    %c0_i32_1 = arith.constant 0 : i32
    return %arg1, %c0_i32, %c0_i32_0 : i32, i32, i32
  }
  func.func @transform_15(%arg0: i32, %arg1: i32) -> (i32, i32, i32) {
    %c0_i32 = arith.constant 0 : i32
    %c0_i32_0 = arith.constant 0 : i32
    %c0_i32_1 = arith.constant 0 : i32
    return %arg1, %c0_i32, %c0_i32_0 : i32, i32, i32
  }
  func.func @transform_16(%arg0: i32, %arg1: i32) -> (i32, i32, i32) {
    %c0_i32 = arith.constant 0 : i32
    %c0_i32_0 = arith.constant 0 : i32
    %c0_i32_1 = arith.constant 0 : i32
    return %arg1, %c0_i32, %c0_i32_0 : i32, i32, i32
  }
  func.func @transform_17(%arg0: i32, %arg1: i32) -> (i32, i32, i32) {
    %c0_i32 = arith.constant 0 : i32
    %c0_i32_0 = arith.constant 0 : i32
    %c0_i32_1 = arith.constant 0 : i32
    return %arg0, %c0_i32, %c0_i32_0 : i32, i32, i32
  }
}

</mosaic_0001>

<bundles_post_ra>
// kernel: tpu_custom_call.1
= control target key start
LH: loop header
LB: loop body
LE: loop exit
PB: predicated region body
PF: predicated region fallthrough
CT: control target
= control target key end

     0   :  { %s3252_s0 = inlined_call_operand.hbm [shape: f32[2,8,32], index: 0, kind: input, shape index: {}]   ;;  %s3253_s1 = inlined_call_operand.hbm [shape: f32[2,8,32], index: 1, kind: input, shape index: {}]   ;;  %s3254_s2 = inlined_call_operand.hbm [shape: f32[2,8,32], index: 2, kind: input, shape index: {}]   ;;  %s3255_s3 = inlined_call_operand.vmem [shape: bf16[2,32,32], index: 3, kind: input, shape index: {}]   ;;  %s3256_s4 = inlined_call_operand.vmem [shape: f32[2,1,32], index: 4, kind: input, shape index: {}]   ;;  %s3257_s5 = inlined_call_operand.vmem [shape: bf16[2,32,32], index: 5, kind: input, shape index: {}]   ;;  %s3258_s6 = inlined_call_operand.vmem [shape: f32[2,1,32], index: 6, kind: input, shape index: {}]   ;;  %s3259_s7 = inlined_call_operand.vmem [shape: bf16[2,32,32], index: 7, kind: input, shape index: {}]   ;;  %s3260_s8 = inlined_call_operand.vmem [shape: f32[2,1,32], index: 8, kind: input, shape index: {}]   ;;  %s3261_s9 = inlined_call_operand.vmem [shape: bf16[2,32,32], index: 9, kind: input, shape index: {}]   ;;  %s3262_s10 = inlined_call_operand.vmem [shape: f32[2,1,32], index: 10, kind: input, shape index: {}]   ;;  %s3263_s11 = inlined_call_operand.vmem [shape: f32[2,1,32], index: 11, kind: input, shape index: {}]   ;;  %s3264_s12 = inlined_call_operand.vmem [shape: f32[2,1,32], index: 12, kind: input, shape index: {}]   ;;  %s3265_s13 = inlined_call_operand.vmem [shape: bf16[2,32,128], index: 13, kind: input, shape index: {}]   ;;  %s3266_s14 = inlined_call_operand.vmem [shape: f32[2,1,128], index: 14, kind: input, shape index: {}]   ;;  %s3267_s15 = inlined_call_operand.vmem [shape: bf16[2,128,32], index: 15, kind: input, shape index: {}]   ;;  %s3268_s16 = inlined_call_operand.vmem [shape: f32[2,1,32], index: 16, kind: input, shape index: {}]   ;;  %s3269_s17 = inlined_call_operand.hbm [shape: f32[2,8,32], index: 17, kind: output, shape index: {}]  }
   0x1   :  { %3285 = sst [smem:[#allocation27_spill]] %s3252_s0 }
   0x2   :  { %3286 = sst [smem:[#allocation28_spill]] %s3253_s1 }
   0x3   :  { %3287 = sst [smem:[#allocation29_spill]] %s3254_s2 }
   0x4   :  { %3288 = sst [smem:[#allocation30_spill]] %s3255_s3 }
   0x5   :  { %3289 = sst [smem:[#allocation31_spill]] %s3257_s5 }
   0x6   :  { %3290 = sst [smem:[#allocation32_spill]] %s3259_s7 }
   0x7   :  { %3291 = sst [smem:[#allocation33_spill]] %s3260_s8 }
   0x8   :  { %3292 = sst [smem:[#allocation34_spill]] %s3261_s9 }
   0x9   :  { %3293 = sst [smem:[#allocation35_spill]] %s3262_s10 }
   0xa   :  { %3294 = sst [smem:[#allocation36_spill]] %s3263_s11 }
   0xb   :  { %3295 = sst [smem:[#allocation37_spill]] %s3264_s12 }
   0xc   :  { %3296 = sst [smem:[#allocation38_spill]] %s3265_s13 }
   0xd   :  { %3297 = sst [smem:[#allocation39_spill]] %s3266_s14 }
   0xe   :  { %3298 = sst [smem:[#allocation40_spill]] %s3267_s15 }
   0xf   :  { %3299 = sst [smem:[#allocation41_spill]] %s3268_s16 }
  0x10   :  { %3300 = sst [smem:[#allocation42_spill]] %s3269_s17 }
  0x11   :  { %22 = vsyncpa [#allocation4], 0 }
  0x12   :  { %24 = vsyncpa [#allocation4 + $0x1], 0 }
  0x13   :  { %25 = vsyncpa [#allocation7], 0 }
  0x14   :  { %27 = vsyncpa [#allocation7 + $0x1], 0 }
  0x15   :  { %28 = vsyncpa [#allocation5], 0 }
  0x16   :  { %30 = vsyncpa [#allocation5 + $0x1], 0  ;;  %s2805_s24 = smov 0   ;;  %s2807_s25 = smov 0  }
  0x17   :  { %s2809_s26 = smov 0   ;;  %s2811_s27 = smov 0  }
  0x18   :  { %s2813_s28 = smov 0   ;;  %s2815_s29 = smov 0  }
  0x19   :  { %s2817_s0 = smov 0   ;;  %s2819_s30 = smov 0  }
  0x1a LB: > { %3301 = sst [smem:[#allocation13_spill]] %s2673_s24  ;;  %s2846_s18 = sadd.s32 4294967295, %s2701_s30   ;;  %s2701_s30 = sphi %s2819_s30, %s36_s30   ;;  %s2697_s0 = sphi %s2817_s0, %s3362_s0   ;;  %s2693_s29 = sphi %s2815_s29, %s3361_s29   ;;  %s2689_s28 = sphi %s2813_s28, %s3360_s28   ;;  %s2685_s27 = sphi %s2811_s27, %s3359_s27   ;;  %s2681_s26 = sphi %s2809_s26, %s3358_s26   ;;  %s2677_s25 = sphi %s2807_s25, %s3357_s25   ;;  %s2673_s24 = sphi %s2805_s24, %s3356_s24  }
  0x1b   : > { %3302 = sst [smem:[#allocation14_spill]] %s2677_s25  ;;  %s2147_s19 = sadd.s32 4294967294, %s2701_s30  }
  0x1c   : > { %3303 = sst [smem:[#allocation15_spill]] %s2681_s26  ;;  %s45_s1 = sadd.s32 1, %s2693_s29 }
  0x1d   : > { %3304 = sst [smem:[#allocation16_spill]] %s2689_s28  ;;  %s48_s20 = sadd.s32 1, %s2697_s0 }
  0x1e   : > { %3305 = sst [smem:[#allocation17_spill]] %s2693_s29  ;;  %p46_p0 = scmp.ge.s32.totalorder %s45_s1, 2 }
  0x1f   : > { %3306 = sst [smem:[#allocation18_spill]] %s2697_s0  ;;  %s55_s21 = sadd.s32 1, %s2681_s26 }
  0x20   : > { %3307 = sst [smem:[#allocation19_spill]] %s2701_s30  ;;  %p62_p1 = scmp.ne.s32.totalorder %s2681_s26, %s2677_s25 }
  0x21   : > { %p63_p2 = scmp.eq.s32.totalorder %s2701_s30, 0  ;;  %s3364_s1 = smov (%p46_p0, %s45_s1), 0 }
  0x22   : > { %3308 = sst [smem:[#allocation20_spill]] %s3364_s1  ;;  %s3366_s20 = smov (!%p46_p0, %s48_s20), %s2697_s0 }
  0x23   : > { %p2858_p3 = por %p63_p2, %p62_p1  ;;  %p68_p4 = scmp.ne.s32.totalorder %s2677_s25, %s2673_s24 }
  0x24   : > { %p50_p5 = scmp.ge.s32.totalorder %s3366_s20, 2  ;;  %p69_p6 = scmp.eq.s32.totalorder %s2846_s18, 0 }
  0x25   : > { %p508_p7 = scmp.eq.s32.totalorder %s2846_s18, 3  ;;  %p514_p8 = scmp.eq.s32.totalorder %s2147_s19, 3 }
  0x26   : > { %s3368_s20 = smov (%p50_p5, %s3366_s20), 0  ;;  %p2868_p9 = por %p69_p6, %p68_p4 }
  0x27   : > { %3310 = sst [smem:[#allocation21_spill]] %s3368_s20  ;;  %p2872_p10 = por %p508_p7, %p62_p1 }
  0x28   : > { %s52_s29 = ssub.s32 %s2697_s0, %s3368_s20  ;;  %p2878_p11 = por %p514_p8, %p68_p4 }
  0x29   : > { %s3312_s1 = scalar_select %p2872_p10, 1, 0 }
  0x2a   : > { %s3314_s24 = scalar_select %p2878_p11, 1, 0 }
  0x2b   : > { %3313 = sst [smem:[#allocation22_spill]] %s3312_s1  ;;  %p53_p12 = scmp.eq.s32.totalorder %s52_s29, 0 }
  0x2c   : > { %3315 = sst [smem:[#allocation23_spill]] %s3314_s24  ;;  %p2399_p13 = scmp.lt.s32.totalorder %s2701_s30, 4 }
  0x2d   : > { %s3277_s19 = sand.u32 1, %s2681_s26   ;;  %s2892_s16 = sshll.u32 %s2697_s0, 7 }
  0x2e   : > { %s2885_s17 = scalar_select %p53_p12, %s2681_s26, %s55_s21  }
  0x2f   : > { %s2889_s28 = sshll.u32 %s3277_s19, 3  ;;  %p2896_p0 = pnand %p2399_p13, %p2858_p3 }
  0x30   : > { %3316 = sst [smem:[#allocation24_spill]] %s2885_s17  ;;  %s552_s20 = sand.u32 1, %s2701_s30  }
  0x31   : > { %s3318_s15 = sld [smem:[#allocation28_spill]]  ;;  %s556_s17 = scalar_lea.vmem [#allocation6], %s2889_s28 }
  0x32   : > { %s563_s14 = sshll.u32 %s556_s17, 4  ;;  %p2156_p1 = scmp.ge.s32.totalorder %s2701_s30, 1  ;;  %s564_s14 = int_to_ptr.vmem [resolvable:$true] %s563_s14 }
  0x33   : > { %p682_p2 = scmp.lt.s32.totalorder %s2701_s30, 5  ;;  %s2908_s19 = scalar_lea.sflag [#allocation7], %s552_s20 }
  0x34   : > { %p2519_p4 = pneg %p2896_p0  ;;  %s2530_s22 = scalar_lea.vmem %s564_s14, 128 }
  0x35   : > { %p2531_p3 = scmp.ne.s32.totalorder %s564_s14, %s2530_s22  ;;  %s2703_s0 = smov [#allocation6]  }
  0x36   : > { %s2535_s13 = sshll.u32 %s2703_s0, 4  ;;  %s2536_s13 = int_to_ptr.vmem [resolvable:$false] %s2535_s13 }
  0x37   : > { %s561_s21 = scalar_lea.hbm %s3318_s15, %s2892_s16  ;;  %p2533_p5 = pnand %p2531_p3, %p2519_p4 }
  0x38   : > { %s2537_s24 = scalar_lea.vmem %s2536_s13, 256  ;;  %p2538_p7 = scmp.lt.s32.totalorder %s564_s14, %s2536_s13 }
  0x39   : > { %p2534_p6 = pneg %p2533_p5  ;;  %p2539_p8 = scmp.lt.s32.totalorder %s2537_s24, %s2530_s22 }
  0x3b   : > { %p2540_p12 = por %p2539_p8, %p2538_p7 }
  0x3d   : > { %p2541_p13 = pnand %p2540_p12, %p2534_p6 }
  0x3f   : > { %2544 = shalt.err (!%p2541_p13)
}
  0x40   : > { %2391 = dma.hbm_to_vmem [thread:$0]  (!%p2896_p0), %s561_s21, 128, %s564_s14, %s2908_s19  }
  0x41   : > { %p2922_p3 = pnand %p2156_p1, %p682_p2  ;;  %s3320_s0 = sld [smem:[#allocation27_spill]] }
  0x42   : > { %s538_s29 = scalar_lea.vmem [#allocation3], %s2889_s28  ;;  %s3321_s2 = sld [smem:[#allocation29_spill]] }
  0x43   : > { %s545_s22 = sshll.u32 %s538_s29, 4  ;;  %s3322_s10 = sand.u32 1, %s2681_s26   ;;  %s546_s22 = int_to_ptr.vmem [resolvable:$true] %s545_s22 }
  0x44   : > { %s535_s9 = scalar_lea.sflag [#allocation4], %s3322_s10  ;;  %s2558_s14 = scalar_lea.vmem %s546_s22, 128 }
  0x45   : > { %p2559_p5 = scmp.ne.s32.totalorder %s546_s22, %s2558_s14  ;;  %s2704_s21 = smov [#allocation3]  }
  0x46   : > { %s2563_s30 = sshll.u32 %s2704_s21, 4  ;;  %s2564_s30 = int_to_ptr.vmem [resolvable:$false] %s2563_s30 }
  0x47   : > { %s543_s20 = scalar_lea.hbm %s3320_s0, %s2892_s16  ;;  %p2561_p1 = pnand %p2559_p5, %p2519_p4 }
  0x48   : > { %s579_s11 = scalar_lea.hbm %s3321_s2, %s2892_s16  ;;  %s2565_s13 = scalar_lea.vmem %s2564_s30, 256 }
  0x49   : > { %p2562_p2 = pneg %p2561_p1  ;;  %p2566_p6 = scmp.lt.s32.totalorder %s546_s22, %s2564_s30 }
  0x4a   : > { %p2567_p7 = scmp.lt.s32.totalorder %s2565_s13, %s2558_s14 }
  0x4c   : > { %p2568_p8 = por %p2567_p7, %p2566_p6 }
  0x4e   : > { %p2569_p12 = pnand %p2568_p8, %p2562_p2 }
  0x50   : > { %2572 = shalt.err (!%p2569_p12)
}
  0x51   : > { %2388 = dma.hbm_to_vmem [thread:$0]  (!%p2896_p0), %s543_s20, 128, %s546_s22, %s535_s9  }
  0x52   : > { %s574_s10 = scalar_lea.vmem [#allocation8], %s2889_s28  ;;  %s2705_s0 = smov [#allocation8]  }
  0x53   : > { %s581_s12 = sshll.u32 %s574_s10, 4  ;;  %s2591_s30 = sshll.u32 %s2705_s0, 4  ;;  %s582_s12 = int_to_ptr.vmem [resolvable:$true] %s581_s12  ;;  %s2592_s30 = int_to_ptr.vmem [resolvable:$false] %s2591_s30 }
  0x54   : > { %s2586_s17 = scalar_lea.vmem %s582_s12, 128  ;;  %s2593_s29 = scalar_lea.vmem %s2592_s30, 256 }
  0x55   : > { %p2587_p13 = scmp.ne.s32.totalorder %s582_s12, %s2586_s17  ;;  %p2594_p2 = scmp.lt.s32.totalorder %s582_s12, %s2592_s30 }
  0x56   : > { %p2595_p6 = scmp.lt.s32.totalorder %s2593_s29, %s2586_s17 }
  0x57   : > { %p2589_p5 = pnand %p2587_p13, %p2519_p4 }
  0x58   : > { %p2596_p7 = por %p2595_p6, %p2594_p2 }
  0x59   : > { %p2590_p1 = pneg %p2589_p5 }
  0x5b   : > { %p2597_p8 = pnand %p2596_p7, %p2590_p1 }
  0x5d   : > { %2600 = shalt.err (!%p2597_p8)
}
  0x5e   : > { %2394 = dma.hbm_to_vmem [thread:$0]  (!%p2896_p0), %s579_s11, 128, %s582_s12, %s2908_s19  }
  0x5f   : > { %686 = sbr.rel (%p2922_p3) target bundleno = 2288 (0x8f0), region = 88 }
  0x64   : > { %s2957_s20 = sand.u32 1, %s2677_s25  }
  0x65   : > { %3323 = sst [smem:[#allocation25_spill]] %s2957_s20  ;;  %s2960_s22 = sshll.u32 %s2957_s20, 3 }
  0x66   : > { %s689_s1 = scalar_lea.sflag [#allocation4], %s2957_s20  ;;  %s692_s24 = scalar_lea.vmem [#allocation3], %s2960_s22 }
  0x67   : > { %2660 = dma.done.wait (%p2868_p9), %s689_s1, 128  }
  0x68   : > { %2662 = vsyncadd (%p2868_p9), %s689_s1, 4294967168  ;;  %s697_s11 = sand.u32 1, %s2846_s18  }
  0x69   : > { %s698_s16 = scalar_lea.sflag [#allocation7], %s697_s11 }
  0x6a   : > { %2664 = dma.done.wait (%p2868_p9), %s698_s16, 256  }
  0x6b   : > { %2666 = vsyncadd (%p2868_p9), %s698_s16, 4294967040  ;;  %p825_p0 = scmp.lt.s32.totalorder %s2685_s27, 1  ;;  %s3324_s3 = sld [smem:[#allocation30_spill]] }
  0x6c   : > { %s3325_s5 = sld [smem:[#allocation31_spill]]  ;;  %s3042_s11 = scalar_lea.vmem [#allocation9], %s2960_s22 }
  0x6d   : > { %s2976_s15 = scalar_select %p825_p0, %s2685_s27, 1 }
  0x6e   : > { %s3326_s7 = sld [smem:[#allocation32_spill]]  ;;  %p2173_p9 = scmp.ne.s32.totalorder %s2685_s27, 0 }
  0x6f   : > { %s2220_s18 = sshll.u32 %s2976_s15, 4  ;;  %s3328_s19 = sld [smem:[#allocation34_spill]] }
  0x70   : > { %s3331_s28 = sld [smem:[#allocation36_spill]]  ;;  %s2225_s8 = sshll.u32 %s2976_s15, 6 }
  0x71   : > { %s829_s12 = scalar_lea.vmem %s3324_s3, %s2220_s18  ;;  %s3333_s21 = sld [smem:[#allocation38_spill]] }
  0x72   : > { %s2989_s30 = scalar_lea.vmem %s3325_s5, %s2220_s18  ;;  %s3334_s10 = sld [smem:[#allocation39_spill]] }
  0x73   : > { %s3335_s0 = sld [smem:[#allocation40_spill]] }
  0x74   : > { %s2998_s16 = scalar_lea.vmem %s3326_s7, %s2220_s18  ;;  %s3332_s7 = sld [smem:[#allocation37_spill]] }
  0x75   : > { %s3007_s2 = scalar_lea.vmem %s3328_s19, %s2220_s18  ;;  %s3336_s9 = sld [smem:[#allocation41_spill]] }
  0x76   : > { %3329 = sst [smem:[#allocation26_spill]] %s3007_s2  ;;  %s859_s26 = scalar_lea.vmem %s3331_s28, %s2976_s15 }
  0x77   : > { %s3024_s13 = scalar_lea.vmem %s3333_s21, %s2220_s18  ;;  %883 = sbr.rel (%p2173_p9) target bundleno = 126 (0x7e), region = 104 }
  0x78   : > { %s870_s2 = scalar_lea.vmem %s3334_s10, %s2976_s15 }
  0x79   : > { %s3034_s5 = scalar_lea.vmem %s3335_s0, %s2225_s8 }
  0x7a   : > { %s862_s25 = scalar_lea.vmem %s3332_s7, %s2976_s15  ;;  %s710_s7 = scalar_lea.vmem [#allocation8], %s2960_s22 }
  0x7b   : > { %s878_s1 = scalar_lea.vmem %s3336_s9, %s2976_s15 }
  0x7c   : > { %v884_v0 = vld [vmem:[%s692_s24] sm:$0xff]  ;;  %vm885_vm0 = vcmask 261120  }
  0x7d   : > { %886 = vst.msk [vmem:[%s3042_s11] sm:$0xff] %vm885_vm0, %v884_v0 }
  0x7e PF: > { %v2473_v1 = vld [vmem:[%s829_s12 + $0x8] sm:$0xff]   ;;  %v2706_v2 = vmov 0.0   ;;  %v2474_v3 = vld [vmem:[%s829_s12] sm:$0xff]   ;;  %vm2707_vm1 = vmmov 0   ;;  %s3337_s8 = scalar_lea.vmem [#allocation6], %s2960_s22  ;;  %vm914_vm2 = vcmask 261120   ;;  %s3338_s22 = scalar_lea.vmem %s3258_s6, %s2976_s15 }
  0x7f   : > { %2269 = vmatprep.subr.bf16.mxu0 %v2706_v2  ;;  %2293 = vmatprep.subr.bf16.mxu1 %v2706_v2  ;;  %v888_v4 = vld [vmem:[%s3337_s8] sm:$0xff]  ;;  %v2475_v5 = vld [vmem:[%s2989_s30 + $0x8] sm:$0xff]   ;;  %s3339_s12 = scalar_lea.vmem %s3256_s4, %s2976_s15  ;;  %vm1095_vm3 = vcmask 64512   ;;  %s2709_s14 = smov 120   ;;  %vm1157_vm4 = vcmask 1043456   ;;  %vm1202_vm5 = vcmask 60416  }
  0x80   : > { %2270 = vmatpush3.bf16.msra.mxu0 %v2473_v1  ;;  %2273 = vmatprep.mubr.msk.bf16.mxu0 %vm2707_vm1, %v2706_v2  ;;  %v890_v6 = vpack.c.bf16 %v888_v4, %v888_v4  ;;  %v2476_v7 = vld [vmem:[%s2989_s30] sm:$0xff]   ;;  %s2708_s30 = smov 112   ;;  %s2710_s21 = smov 104   ;;  %v2477_v25 = vld [vmem:[%s2998_s16 + $0x8] sm:$0xff]   ;;  %vm1324_vm6 = vcmask 126016   ;;  %vm1443_vm7 = vcmask 191616  }
  0x81   : > { %2271 = vmatprep.subr.bf16.mxu0 %v2706_v2  ;;  %2295 = vmatprep.mubr.msk.bf16.mxu1 %vm2707_vm1, %v2706_v2  ;;  %v889_v8 = vld [vmem:[%s710_s7] sm:$0xff]  ;;  %v2178_v14 = vld [vmem:[%s3338_s22] ss:$0 sm:$0xff]  ;;  %s3340_s19 = sld [smem:[#allocation33_spill]]  ;;  %s2711_s3 = smov 8   ;;  %vm1562_vm8 = vcmask 257216  }
  0x82   : > { %v958_v9 = vpack.c.bf16 %v889_v8, %v889_v8  ;;  %v2174_v15 = vld [vmem:[%s3339_s12] ss:$0 sm:$0xff]  ;;  %s3342_s17 = sld [smem:[#allocation26_spill]]  ;;  %s2712_s0 = smov 16  }
  0x83   : > { %v2478_v26 = vld [vmem:[%s2998_s16] sm:$0xff]   ;;  %s2713_s28 = smov 24   ;;  %s3343_s7 = sld [smem:[#allocation35_spill]] }
  0x84   : > { %2272 = vmatpush3.bf16.msra.mxu0 %v2474_v3  ;;  %v3090_v27 = vld [vmem:[%s3042_s11] sm:$0xff] }
  0x85   : > { %2277 = vmatprep.subr.bf16.mxu0 %v2706_v2  ;;  %v1025_v28 = vpack.c.bf16 %v3090_v27, %v3090_v27 }
  0x87   : > { %2274 = vmatmul.mubr.msk.bf16.vlgmr.msra.gmra.mxu0 %vm914_vm2, %v890_v6  ;;  %s3341_s10 = scalar_lea.vmem %s3340_s19, %s2976_s15  ;;  %s1878_s19 = sshll.u32 %s3042_s11, 4  ;;  %s1879_s19 = int_to_ptr.vmem [resolvable:$true] %s1878_s19 }
  0x88   : > { %2278 = vmatpush3.bf16.msra.mxu0 %v2475_v5  ;;  %2281 = vmatprep.mubr.msk.bf16.mxu0 %vm2707_vm1, %v2706_v2  ;;  %v2182_v43 = vld [vmem:[%s3341_s10] ss:$0 sm:$0xff]  ;;  %s2601_s29 = scalar_lea.vmem %s1879_s19, 128 }
  0x89   : > { %2279 = vmatprep.subr.bf16.mxu0 %v2706_v2  ;;  %s3344_s8 = scalar_lea.vmem %s3343_s7, %s2976_s15  ;;  %p2602_p4 = scmp.ne.s32.totalorder %s1879_s19, %s2601_s29 }
  0x8a   : > { %s2714_s15 = smov [#allocation9]  }
  0x8b   : > { %p2603_p3 = pnand %p2602_p4, %p2872_p10 }
  0x8c   : > { %2280 = vmatpush3.bf16.msra.mxu0 %v2476_v7 }
  0x8d   : > { %2285 = vmatprep.subr.bf16.mxu0 %v2706_v2  ;;  %p2604_p12 = pneg %p2603_p3 }
  0x8f   : > { %2282 = vmatmul.mubr.msk.bf16.vlgmr.msra.gmra.mxu0 %vm914_vm2, %v958_v9 }
  0x90   : > { %2289 = vmatprep.mubr.msk.bf16.mxu0 %vm2707_vm1, %v2706_v2  ;;  %2286 = vmatpush3.bf16.msra.mxu0 %v2477_v25 }
  0x91   : > { %2287 = vmatprep.subr.bf16.mxu0 %v2706_v2 }
  0x94   : > { %2288 = vmatpush3.bf16.msra.mxu0 %v2478_v26 }
  0x95   : > { %2299 = vmatprep.subr.bf16.mxu0 %v2706_v2 }
  0x97   : > { %2290 = vmatmul.mubr.msk.bf16.vlgmr.msra.gmra.mxu0 %vm914_vm2, %v1025_v28 }
  0x98   : > { %2301 = vmatprep.mubr.msk.bf16.mxu0 %vm2707_vm1, %v2706_v2 }
 0x147   : > { %v952_v10 = vpop.f32.mrf.mxu0 }
 0x148   : > { %v953_v19 = vadd.f32 %v2174_v15, %v952_v10 }
 0x149   : > { %v2275_v11 = vpop.f32.mrf.mxu0 }
 0x14a   : > { %v1092_v24 = vpack.c.bf16 %v953_v19, %v953_v19 }
 0x14b   : > { %v955_v12 = vpop.f32.mrf.mxu0 }
 0x14d   : > { %v2276_v13 = vpop.f32.mrf.mxu0 }
 0x14f   : > { %v1019_v16 = vpop.f32.mrf.mxu0 }
 0x150   : > { %v1020_v17 = vadd.f32 %v2178_v14, %v1019_v16 }
 0x151   : > { %v2283_v18 = vpop.f32.mrf.mxu0 }
 0x152   : > { %v1093_v20 = vpack.c.bf16 %v1020_v17, %v1020_v17 }
 0x153   : > { %v1022_v21 = vpop.f32.mrf.mxu0 }
 0x154   : > { %1328 = vrot.lane.b32.xlu1 %v1093_v20, %s2708_s30  ;;  %1208 = vrot.lane.b32.xlu0 %v1093_v20, %s2709_s14  ;;  %v1100_v22 = vsel %vm1095_vm3, %v1093_v20, 0 }
 0x155   : > { %v2284_v23 = vpop.f32.mrf.mxu0  ;;  %2294 = vmatpush3.bf16.xpose.msra.mxu1 %v1100_v22 }
 0x156   : > { %2305 = vmatprep.subr.bf16.mxu1 %v2706_v2 }
 0x157   : > { %v1086_v44 = vpop.f32.mrf.mxu0 }
 0x158   : > { %1326 = vrot.lane.b32.xlu1 %v1092_v24, %s2708_s30  ;;  %1205 = vrot.lane.b32.xlu0 %v1092_v24, %s2709_s14  ;;  %v1087_v45 = vadd.f32 %v2182_v43, %v1086_v44 }
 0x159   : > { %v2291_v46 = vpop.f32.mrf.mxu0 }
 0x15a   : > { %v1094_v47 = vpack.c.bf16 %v1087_v45, %v1087_v45 }
 0x15b   : > { %v1089_v48 = vpop.f32.mrf.mxu0 }
 0x15c   : > { %1445 = vrot.lane.b32.xlu1 %v1092_v24, %s2710_s21  ;;  %1447 = vrot.lane.b32.xlu0 %v1093_v20, %s2710_s21  ;;  %v1159_v49 = vsel %vm1157_vm4, %v1094_v47, 0 }
 0x15d   : > { %2296 = vmatmul.mubr.msk.bf16.vlgmr.msra.gmra.mxu1 %vm1095_vm3, %v1092_v24  ;;  %v2292_v50 = vpop.f32.mrf.mxu0  ;;  %2300 = vmatpush3.bf16.msra.mxu0 %v1159_v49 }
 0x15e   : > { %2307 = vmatprep.mubr.msk.bf16.mxu1 %vm2707_vm1, %v2706_v2  ;;  %2311 = vmatprep.subr.bf16.mxu0 %v2706_v2 }
 0x1c6   : > { %v1209_v29 = vpop.permute.xlu0 %1208  ;;  %v1329_v31 = vpop.permute.xlu1 %1328 }
 0x1c7   : > { %v1214_v30 = vsel %vm1095_vm3, %v1209_v29, 0  ;;  %v1334_v33 = vsel %vm1095_vm3, %v1329_v31, 0 }
 0x1c8   : > { %2306 = vmatpush3.bf16.xpose.msra.mxu1 %v1214_v30 }
 0x1c9   : > { %2317 = vmatprep.subr.bf16.mxu1 %v2706_v2 }
 0x1ca   : > { %v1206_v32 = vpop.permute.xlu0 %1205  ;;  %v1327_v35 = vpop.permute.xlu1 %1326 }
 0x1ce   : > { %v1448_v34 = vpop.permute.xlu0 %1447  ;;  %v1446_v37 = vpop.permute.xlu1 %1445 }
 0x1cf   : > { %2308 = vmatmul.mubr.msk.bf16.vlgmr.msra.gmra.mxu1 %vm1095_vm3, %v1206_v32  ;;  %v1453_v36 = vsel %vm1095_vm3, %v1448_v34, 0 }
 0x1d0   : > { %2318 = vmatpush3.bf16.xpose.msra.mxu1 %v1334_v33  ;;  %2319 = vmatprep.mubr.msk.bf16.mxu1 %vm2707_vm1, %v2706_v2 }
 0x1d1   : > { %2329 = vmatprep.subr.bf16.mxu1 %v2706_v2 }
 0x1d7   : > { %2320 = vmatmul.mubr.msk.bf16.vlgmr.msra.gmra.mxu1 %vm1095_vm3, %v1327_v35 }
 0x1d8   : > { %2330 = vmatpush3.bf16.xpose.msra.mxu1 %v1453_v36  ;;  %2331 = vmatprep.mubr.msk.bf16.mxu1 %vm2707_vm1, %v2706_v2 }
 0x1d9   : > { %2341 = vmatprep.subr.bf16.mxu1 %v2706_v2 }
 0x1df   : > { %2332 = vmatmul.mubr.msk.bf16.vlgmr.msra.gmra.mxu1 %vm1095_vm3, %v1446_v37 }
 0x1e0   : > { %2345 = vmatprep.mubr.msk.bf16.mxu1 %vm2707_vm1, %v2706_v2 }
 0x21d   : > { %v1136_v38 = vpop.f32.mrf.mxu1 }
 0x21e   : > { %v1142_v39 = vsel %vm1095_vm3, %v1136_v38, -inf }
 0x21f   : > { %1143 = vmax.xlane.f32.xlu0 %v1142_v39  ;;  %v2297_v40 = vpop.f32.mrf.mxu1 }
 0x221   : > { %v1139_v41 = vpop.f32.mrf.mxu1 }
 0x223   : > { %v2298_v42 = vpop.f32.mrf.mxu1 }
 0x28f   : > { %v1250_v51 = vpop.f32.mrf.mxu1 }
 0x290   : > { %v1256_v52 = vsel %vm1095_vm3, %v1250_v51, -inf }
 0x291   : > { %1257 = vmax.xlane.f32.xlu1 %v1256_v52  ;;  %v2309_v53 = vpop.f32.mrf.mxu1 }
 0x293   : > { %v1253_v54 = vpop.f32.mrf.mxu1 }
 0x295   : > { %v2310_v55 = vpop.f32.mrf.mxu1 }
 0x297   : > { %v1370_v56 = vpop.f32.mrf.mxu1 }
 0x298   : > { %v1376_v57 = vsel %vm1095_vm3, %v1370_v56, -inf }
 0x299   : > { %1377 = vmax.xlane.f32.xlu0 %v1376_v57  ;;  %v2321_v58 = vpop.f32.mrf.mxu1 }
 0x29a   : > { %v2480_v58 = vld [vmem:[%s3342_s17] sm:$0xff]  }
 0x29b   : > { %v1373_v59 = vpop.f32.mrf.mxu1 }
 0x29d   : > { %v2322_v60 = vpop.f32.mrf.mxu1 }
 0x29f   : > { %v1489_v61 = vpop.f32.mrf.mxu1 }
 0x2a0   : > { %v1495_v62 = vsel %vm1095_vm3, %v1489_v61, -inf }
 0x2a1   : > { %1496 = vmax.xlane.f32.xlu0 %v1495_v62  ;;  %v2333_v63 = vpop.f32.mrf.mxu1 }
 0x2a3   : > { %v1492_v0 = vpop.f32.mrf.mxu1 }
 0x2a5   : > { %v2334_v1 = vpop.f32.mrf.mxu1 }
 0x2a8   : > { %v1144_v3 = vpop.xlane.xlu0 %1143 }
 0x2a9   : > { %v1145_v4 = vsub.f32 %v1136_v38, %v1144_v3 }
 0x2ab   : > { %v1146_v5 = vmul.f32 1.442695, %v1145_v4 }
 0x2ad   : > { %2491 = vpow2.f32 %v1146_v5 }
 0x2ba   : > { %v2492_v6 = vpop.eup %2491 }
 0x2bb   : > { %v1148_v7 = vsel %vm1095_vm3, %v2492_v6, 0.0 }
 0x2bc   : > { %1149 = vadd.xlane.f32.xlu1 %v1148_v7 }
 0x2cd   : > { %1269 = vrot.lane.b32.xlu1 %v1094_v47, %s2709_s14 }
 0x31a   : > { %v1258_v8 = vpop.xlane.xlu1 %1257 }
 0x31b   : > { %v1259_v9 = vsub.f32 %v1250_v51, %v1258_v8 }
 0x31d   : > { %v1260_v10 = vmul.f32 1.442695, %v1259_v9  ;;  %v2197_v9 = vld [vmem:[%s3344_s8] ss:$0 sm:$0xff] }
 0x31f   : > { %2493 = vpow2.f32 %v1260_v10 }
 0x322   : > { %v1378_v11 = vpop.xlane.xlu0 %1377 }
 0x323   : > { %v1379_v12 = vsub.f32 %v1370_v56, %v1378_v11  ;;  %v2479_v56 = vld [vmem:[%s3342_s17 + $0x8] sm:$0xff]  }
 0x324   : > { %2342 = vmatpush3.bf16.msra.mxu1 %v2479_v56 }
 0x325   : > { %v1380_v13 = vmul.f32 1.442695, %v1379_v12  ;;  %2343 = vmatprep.subr.bf16.mxu1 %v2706_v2 }
 0x327   : > { %2495 = vpow2.f32 %v1380_v13 }
 0x328   : > { %2344 = vmatpush3.bf16.msra.mxu1 %v2480_v58 }
 0x329   : > { %2357 = vmatprep.subr.bf16.mxu1 %v2706_v2 }
 0x32a   : > { %v1497_v14 = vpop.xlane.xlu0 %1496 }
 0x32b   : > { %v1498_v15 = vsub.f32 %v1489_v61, %v1497_v14 }
 0x32c   : > { %v2494_v16 = vpop.eup %2493 }
 0x32d   : > { %v1499_v17 = vmul.f32 1.442695, %v1498_v15  ;;  %v1262_v18 = vsel %vm1095_vm3, %v2494_v16, 0.0 }
 0x32e   : > { %1263 = vadd.xlane.f32.xlu0 %v1262_v18  ;;  %v2481_v18 = vld [vmem:[%s3024_s13 + $0x8] sm:$0xff]  }
 0x32f   : > { %2497 = vpow2.f32 %v1499_v17 }
 0x334   : > { %v2496_v19 = vpop.eup %2495 }
 0x335   : > { %v1382_v20 = vsel %vm1095_vm3, %v2496_v19, 0.0 }
 0x336   : > { %1383 = vadd.xlane.f32.xlu1 %v1382_v20  ;;  %v2483_v20 = vld [vmem:[%s3034_s5 + $0x38] sm:$0xff]  }
 0x33c   : > { %v2498_v21 = vpop.eup %2497 }
 0x33d   : > { %v1501_v22 = vsel %vm1095_vm3, %v2498_v21, 0.0 }
 0x33e   : > { %1502 = vadd.xlane.f32.xlu0 %v1501_v22 }
 0x345   : > { %v1150_v23 = vpop.xlane.xlu1 %1149 }
 0x346   : > { %2499 = vrcp.f32 %v1150_v23 }
 0x347   : > { %1507 = vrot.lane.b32.xlu1 %v1094_v47, %s2710_s21 }
 0x349   : > { %v1270_v25 = vpop.permute.xlu1 %1269 }
 0x34a   : > { %v1275_v29 = vsel %vm1157_vm4, %v1270_v25, 0 }
 0x353   : > { %v2500_v24 = vpop.eup %2499 }
 0x354   : > { %1388 = vrot.lane.b32.xlu0 %v1094_v47, %s2708_s30  ;;  %v1152_v26 = vmul.f32 %v2500_v24, %v2492_v6 }
 0x356   : > { %v1153_v28 = vpack.c.bf16 %v1152_v26, %v1152_v26 }
 0x358   : > { %2302 = vmatmul.mubr.msk.bf16.vlgmr.msra.gmra.mxu0 %vm1095_vm3, %v1153_v28 }
 0x359   : > { %2312 = vmatpush3.bf16.msra.mxu0 %v1275_v29  ;;  %2313 = vmatprep.mubr.msk.bf16.mxu0 %vm2707_vm1, %v2706_v2 }
 0x35a   : > { %2323 = vmatprep.subr.bf16.mxu0 %v2706_v2 }
 0x3b7   : > { %v1264_v30 = vpop.xlane.xlu0 %1263 }
 0x3b8   : > { %2501 = vrcp.f32 %v1264_v30  ;;  %v2201_v30 = vld [vmem:[%s859_s26] ss:$0 sm:$0xff] }
 0x3bf   : > { %v1384_v31 = vpop.xlane.xlu1 %1383 }
 0x3c0   : > { %2503 = vrcp.f32 %v1384_v31 }
 0x3c3   : > { %v1508_v40 = vpop.permute.xlu1 %1507 }
 0x3c4   : > { %v1513_v42 = vsel %vm1157_vm4, %v1508_v40, 0  ;;  %v2490_v40 = vld [vmem:[%s3034_s5] sm:$0xff]  }
 0x3c5   : > { %v2502_v32 = vpop.eup %2501 }
 0x3c6   : > { %v1266_v33 = vmul.f32 %v2502_v32, %v2494_v16 }
 0x3c7   : > { %v1503_v34 = vpop.xlane.xlu0 %1502 }
 0x3c8   : > { %2505 = vrcp.f32 %v1503_v34  ;;  %v1267_v35 = vpack.c.bf16 %v1266_v33, %v1266_v33 }
 0x3ca   : > { %2314 = vmatmul.mubr.msk.bf16.vlgmr.msra.gmra.mxu0 %vm1095_vm3, %v1267_v35  ;;  %v2485_v35 = vld [vmem:[%s3034_s5 + $0x28] sm:$0xff]  }
 0x3cb   : > { %v1389_v36 = vpop.permute.xlu0 %1388  ;;  %2325 = vmatprep.mubr.msk.bf16.mxu0 %vm2707_vm1, %v2706_v2 }
 0x3cc   : > { %v1394_v37 = vsel %vm1157_vm4, %v1389_v36, 0  ;;  %v2486_v36 = vld [vmem:[%s3034_s5 + $0x20] sm:$0xff]  }
 0x3cd   : > { %v2504_v38 = vpop.eup %2503  ;;  %2324 = vmatpush3.bf16.msra.mxu0 %v1394_v37  ;;  %v2487_v37 = vld [vmem:[%s3034_s5 + $0x18] sm:$0xff]  }
 0x3ce   : > { %2335 = vmatprep.subr.bf16.mxu0 %v2706_v2  ;;  %v1386_v39 = vmul.f32 %v2504_v38, %v2496_v19  ;;  %v2482_v19 = vld [vmem:[%s3024_s13] sm:$0xff]   ;;  %v2488_v38 = vld [vmem:[%s3034_s5 + $0x10] sm:$0xff]  }
 0x3d0   : > { %v1387_v41 = vpack.c.bf16 %v1386_v39, %v1386_v39  ;;  %v2489_v39 = vld [vmem:[%s3034_s5 + $0x8] sm:$0xff]  }
 0x3d2   : > { %2326 = vmatmul.mubr.msk.bf16.vlgmr.msra.gmra.mxu0 %vm1095_vm3, %v1387_v41  ;;  %v2202_v41 = vld [vmem:[%s870_s2] ss:$0 sm:$0xff]  ;;  %s3348_s2 = sld [smem:[#allocation16_spill]] }
 0x3d3   : > { %2336 = vmatpush3.bf16.msra.mxu0 %v1513_v42  ;;  %2337 = vmatprep.mubr.msk.bf16.mxu0 %vm2707_vm1, %v2706_v2 }
 0x3d4   : > { %2349 = vmatprep.subr.bf16.mxu0 %v2706_v2 }
 0x3d5   : > { %v2506_v43 = vpop.eup %2505 }
 0x3d6   : > { %v1505_v44 = vmul.f32 %v2506_v43, %v2498_v21  ;;  %v2484_v21 = vld [vmem:[%s3034_s5 + $0x30] sm:$0xff]  }
 0x3d8   : > { %v1506_v45 = vpack.c.bf16 %v1505_v44, %v1505_v44  ;;  %s2217_s23 = sshll.u32 %s3348_s2, 7 }
 0x3da   : > { %2338 = vmatmul.mubr.msk.bf16.vlgmr.msra.gmra.mxu0 %vm1095_vm3, %v1506_v45 }
 0x3db   : > { %2353 = vmatprep.mubr.msk.bf16.mxu0 %vm2707_vm1, %v2706_v2  ;;  %2350 = vmatpush3.bf16.msra.mxu0 %v2481_v18 }
 0x3dc   : > { %2351 = vmatprep.subr.bf16.mxu0 %v2706_v2 }
 0x3df   : > { %2352 = vmatpush3.bf16.msra.mxu0 %v2482_v19 }
 0x418   : > { %v1195_v46 = vpop.f32.mrf.mxu0 }
 0x419   : > { %v1201_v47 = vpack.c.bf16 %v1195_v46, %v1195_v46 }
 0x41a   : > { %v2303_v48 = vpop.f32.mrf.mxu0 }
 0x41b   : > { %1203 = vst.msk [vmem:[#allocation2] sm:$0xf] %vm1202_vm5, %v1201_v47 }
 0x41c   : > { %v1198_v49 = vpop.f32.mrf.mxu0 }
 0x41e   : > { %v2304_v50 = vpop.f32.mrf.mxu0 }
 0x48a   : > { %v1311_v51 = vpop.f32.mrf.mxu0 }
 0x48b   : > { %v2226_v52 = vpack.c.bf16 %v1311_v51, %v1311_v51 }
 0x48c   : > { %v2315_v53 = vpop.f32.mrf.mxu0 }
 0x48d   : > { %1321 = vrot.lane.b32.xlu1 %v2226_v52, %s2711_s3  ;;  %v2206_v52 = vld [vmem:[%s878_s1] ss:$0 sm:$0xff]  ;;  %s3349_s1 = sld [smem:[#allocation25_spill]] }
 0x48e   : > { %v1314_v54 = vpop.f32.mrf.mxu0  ;;  %s3352_s3 = sld [smem:[#allocation42_spill]] }
 0x490   : > { %v2316_v55 = vpop.f32.mrf.mxu0 }
 0x492   : > { %v1430_v57 = vpop.f32.mrf.mxu0 }
 0x493   : > { %v2227_v59 = vpack.c.bf16 %v1430_v57, %v1430_v57 }
 0x494   : > { %v2327_v60 = vpop.f32.mrf.mxu0 }
 0x495   : > { %1440 = vrot.lane.b32.xlu0 %v2227_v59, %s2712_s0  ;;  %s1876_s0 = scalar_lea.hbm %s3352_s3, %s2217_s23 }
 0x496   : > { %v1433_v61 = vpop.f32.mrf.mxu0 }
 0x498   : > { %v2328_v62 = vpop.f32.mrf.mxu0 }
 0x49a   : > { %v1549_v63 = vpop.f32.mrf.mxu0 }
 0x49b   : > { %v2228_v0 = vpack.c.bf16 %v1549_v63, %v1549_v63 }
 0x49c   : > { %v2339_v1 = vpop.f32.mrf.mxu0 }
 0x49d   : > { %1559 = vrot.lane.b32.xlu1 %v2228_v0, %s2713_s28  ;;  %s1865_s28 = scalar_lea.sflag [#allocation5], %s3349_s1 }
 0x49e   : > { %v1552_v3 = vpop.f32.mrf.mxu0 }
 0x4a0   : > { %v2340_v4 = vpop.f32.mrf.mxu0 }
 0x4ff   : > { %v1322_v5 = vpop.permute.xlu1 %1321 }
 0x500   : > { %1325 = vst.msk [vmem:[#allocation2] sm:$0xf] %vm1324_vm6, %v1322_v5 }
 0x507   : > { %v1441_v6 = vpop.permute.xlu0 %1440 }
 0x508   : > { %1444 = vst.msk [vmem:[#allocation2] sm:$0xf] %vm1443_vm7, %v1441_v6  ;;  %v2215_v6 = vld [vmem:[%s862_s25] ss:$0 sm:$0xff]  ;;  %s2605_s25 = sshll.u32 %s2714_s15, 4  ;;  %s2606_s25 = int_to_ptr.vmem [resolvable:$false] %s2605_s25 }
 0x509   : > { %s2607_s9 = scalar_lea.vmem %s2606_s25, 256  ;;  %p2608_p13 = scmp.lt.s32.totalorder %s1879_s19, %s2606_s25 }
 0x50a   : > { %p2609_p5 = scmp.lt.s32.totalorder %s2607_s9, %s2601_s29 }
 0x50c   : > { %p2610_p1 = por %p2609_p5, %p2608_p13 }
 0x50e   : > { %p2611_p2 = pnand %p2610_p1, %p2604_p12 }
 0x50f   : > { %v1560_v7 = vpop.permute.xlu1 %1559 }
 0x510   : > { %1563 = vst.msk [vmem:[#allocation2] sm:$0xf] %vm1562_vm8, %v1560_v7 }
 0x517   : > { %v1564_v8 = vld [vmem:[#allocation2] sm:$0xf] }
 0x518   : > { %2346 = vmatmul.mubr.msk.bf16.vlgmr.msra.gmra.mxu1 %vm914_vm2, %v1564_v8 }
 0x519   : > { %2373 = vmatprep.mubr.msk.bf16.mxu1 %vm2707_vm1, %v2706_v2  ;;  %2358 = vmatpush3.bf16.msra.mxu1 %v2483_v20 }
 0x51a   : > { %2359 = vmatprep.subr.bf16.mxu1 %v2706_v2 }
 0x51d   : > { %2360 = vmatpush3.bf16.msra.mxu1 %v2484_v21 }
 0x51e   : > { %2361 = vmatprep.subr.bf16.mxu1 %v2706_v2 }
 0x521   : > { %2362 = vmatpush3.bf16.msra.mxu1 %v2485_v35 }
 0x522   : > { %2363 = vmatprep.subr.bf16.mxu1 %v2706_v2 }
 0x525   : > { %2364 = vmatpush3.bf16.msra.mxu1 %v2486_v36 }
 0x526   : > { %2365 = vmatprep.subr.bf16.mxu1 %v2706_v2 }
 0x529   : > { %2366 = vmatpush3.bf16.msra.mxu1 %v2487_v37 }
 0x52a   : > { %2367 = vmatprep.subr.bf16.mxu1 %v2706_v2 }
 0x52d   : > { %2368 = vmatpush3.bf16.msra.mxu1 %v2488_v38 }
 0x52e   : > { %2369 = vmatprep.subr.bf16.mxu1 %v2706_v2 }
 0x531   : > { %2370 = vmatpush3.bf16.msra.mxu1 %v2489_v39 }
 0x532   : > { %2371 = vmatprep.subr.bf16.mxu1 %v2706_v2 }
 0x535   : > { %2372 = vmatpush3.bf16.msra.mxu1 %v2490_v40 }
 0x5d8   : > { %v1625_v10 = vpop.f32.mrf.mxu1 }
 0x5d9   : > { %v1626_v11 = vadd.f32 %v2197_v9, %v1625_v10 }
 0x5da   : > { %v2347_v12 = vpop.f32.mrf.mxu1 }
 0x5db   : > { %v1631_v13 = vadd.f32 %v1626_v11, %v3090_v27 }
 0x5dc   : > { %v1628_v14 = vpop.f32.mrf.mxu1 }
 0x5dd   : > { %v1633_v15 = vmul.f32 %v1631_v13, %v1631_v13  ;;  %v1651_v31 = vmul.f32 %v2201_v30, %v1631_v13 }
 0x5de   : > { %v2348_v16 = vpop.f32.mrf.mxu1 }
 0x5df   : > { %v1634_v17 = vsel %vm914_vm2, %v1633_v15, 0.0 }
 0x5e0   : > { %1635 = vadd.xlane.f32.xlu0 %v1634_v17 }
 0x669   : > { %v1636_v27 = vpop.xlane.xlu0 %1635 }
 0x66a   : > { %2507 = vrsqrt.f32 %v1636_v27  ;;  %vm1639_vm9 = vcmp.eq.f32.partialorder %v1636_v27, inf  ;;  %v1642_v24 = vand.u32 2147483648, %v1636_v27  ;;  %vm1641_vm10 = vcmp.eq.f32.partialorder %v1636_v27, 0.0 }
 0x677   : > { %v2508_v22 = vpop.eup %2507 }
 0x678   : > { %v1638_v23 = vmul.f32 %v2508_v22, %v1636_v27 }
 0x67a   : > { %v1640_v25 = vsel %vm1639_vm9, %v1636_v27, %v1638_v23 }
 0x67b   : > { %v1643_v26 = vsel %vm1641_vm10, %v1642_v24, %v1640_v25 }
 0x67c   : > { %v1644_v28 = vmul.f32 0.17677669, %v1643_v26 }
 0x67e   : > { %v1652_v29 = vadd.f32 1e-08, %v1644_v28 }
 0x680   : > { %2509 = vrcp.f32 %v1652_v29 }
 0x68d   : > { %v2510_v32 = vpop.eup %2509 }
 0x68e   : > { %v1654_v33 = vmul.f32 %v2510_v32, %v1651_v31 }
 0x690   : > { %v1655_v34 = vpack.c.bf16 %v1654_v33, %v1654_v33 }
 0x692   : > { %2354 = vmatmul.mubr.msk.bf16.vlgmr.msra.gmra.mxu0 %vm914_vm2, %v1655_v34 }
 0x752   : > { %v1716_v42 = vpop.f32.mrf.mxu0 }
 0x753   : > { %v1717_v43 = vadd.f32 %v2202_v41, %v1716_v42 }
 0x754   : > { %v2355_v44 = vpop.f32.mrf.mxu0 }
 0x755   : > { %v1723_v45 = vmul.f32 0.70710677, %v1717_v43  ;;  %v1722_v49 = vmul.f32 0.5, %v1717_v43 }
 0x756   : > { %v1719_v46 = vpop.f32.mrf.mxu0 }
 0x757   : > { %2511 = verf.f32 %v1723_v45 }
 0x758   : > { %v2356_v47 = vpop.f32.mrf.mxu0 }
 0x764   : > { %v2512_v48 = vpop.eup %2511 }
 0x765   : > { %v1725_v50 = vadd.f32 1.0, %v2512_v48 }
 0x767   : > { %v1726_v51 = vmul.f32 %v1725_v50, %v1722_v49 }
 0x769   : > { %v1727_v2 = vpack.c.bf16 %v1726_v51, %v1726_v51 }
 0x76b   : > { %2374 = vmatmul.mubr.bf16.vlgmr.msra.gmra.mxu1 %v1727_v2 }
 0x82b   : > { %v1833_v53 = vpop.f32.mrf.mxu1 }
 0x82c   : > { %v1834_v54 = vadd.f32 %v2206_v52, %v1833_v53 }
 0x82d   : > { %v2375_v55 = vpop.f32.mrf.mxu1 }
 0x82e   : > { %v1839_v56 = vadd.f32 %v1834_v54, %v1654_v33 }
 0x82f   : > { %v1836_v57 = vpop.f32.mrf.mxu1 }
 0x830   : > { %v1841_v58 = vmul.f32 %v1839_v56, %v1839_v56  ;;  %v1859_v7 = vmul.f32 %v2215_v6, %v1839_v56 }
 0x831   : > { %v2376_v59 = vpop.f32.mrf.mxu1 }
 0x832   : > { %v1842_v60 = vsel %vm914_vm2, %v1841_v58, 0.0 }
 0x833   : > { %1843 = vadd.xlane.f32.xlu1 %v1842_v60 }
 0x8bc   : > { %v1844_v61 = vpop.xlane.xlu1 %1843 }
 0x8bd   : > { %2513 = vrsqrt.f32 %v1844_v61  ;;  %vm1847_vm11 = vcmp.eq.f32.partialorder %v1844_v61, inf  ;;  %v1850_v0 = vand.u32 2147483648, %v1844_v61  ;;  %vm1849_vm12 = vcmp.eq.f32.partialorder %v1844_v61, 0.0 }
 0x8ca   : > { %v2514_v62 = vpop.eup %2513 }
 0x8cb   : > { %v1846_v63 = vmul.f32 %v2514_v62, %v1844_v61 }
 0x8cd   : > { %v1848_v1 = vsel %vm1847_vm11, %v1844_v61, %v1846_v63 }
 0x8ce   : > { %v1851_v3 = vsel %vm1849_vm12, %v1850_v0, %v1848_v1 }
 0x8cf   : > { %v1852_v4 = vmul.f32 0.17677669, %v1851_v3 }
 0x8d1   : > { %v1860_v5 = vadd.f32 1e-08, %v1852_v4 }
 0x8d3   : > { %2515 = vrcp.f32 %v1860_v5 }
 0x8e0   : > { %v2516_v8 = vpop.eup %2515 }
 0x8e1   : > { %v1862_v9 = vmul.f32 %v2516_v8, %v1859_v7 }
 0x8e3   : > { %1863 = vst.msk [vmem:[%s3042_s11] sm:$0xff] %vm914_vm2, %v1862_v9 }
 0x8e4   : > { %2614 = shalt.err (!%p2611_p2)
}
 0x8e5   : > { %s2615_s7 = scalar_lea.hbm %s1876_s0, 128  ;;  %s2619_s13 = scalar_lea.hbm %s3352_s3, 256 }
 0x8e6   : > { %p2616_p6 = scmp.ne.s32.totalorder %s1876_s0, %s2615_s7  ;;  %p2620_p0 = scmp.lt.s32.totalorder %s1876_s0, %s3352_s3 }
 0x8e7   : > { %p2621_p9 = scmp.lt.s32.totalorder %s2619_s13, %s2615_s7 }
 0x8e8   : > { %p2617_p7 = pnand %p2616_p6, %p2872_p10 }
 0x8e9   : > { %p2622_p4 = por %p2621_p9, %p2620_p0 }
 0x8ea   : > { %p2618_p8 = pneg %p2617_p7 }
 0x8ec   : > { %p2623_p3 = pnand %p2622_p4, %p2618_p8 }
 0x8ee   : > { %2626 = shalt.err (!%p2623_p3)
}
 0x8ef   : > { %2383 = dma.vmem_to_hbm [thread:$0]  (%p2872_p10), %s1879_s19, 128, %s1876_s0, %s1865_s28  }
 0x8f0 PF: > { %s3353_s26 = sld [smem:[#allocation19_spill]] }
 0x8f1   : > { %s3354_s22 = sld [smem:[#allocation13_spill]] }
 0x8f6   : > { %p2400_p12 = scmp.ge.s32.totalorder %s3353_s26, 2 }
 0x8f7   : > { %s1890_s5 = sand.u32 1, %s3354_s22  }
 0x8f8   : > { %p2396_p13 = pnand %p2400_p12, %p2878_p11  ;;  %s1891_s18 = scalar_lea.sflag [#allocation5], %s1890_s5 }
 0x8fa   : > { %p2397_p5 = pneg %p2396_p13 }
 0x8fc   : > { %2668 = dma.done.wait (%p2397_p5), %s1891_s18, 128  }
 0x8fd   : > { %2670 = vsyncadd (%p2397_p5), %s1891_s18, 4294967168  ;;  %s36_s30 = sadd.s32 1, %s3353_s26   ;;  %s3356_s24 = sld [smem:[#allocation14_spill]] }
 0x8fe   : > { %p33_p1 = scmp.ge.s32.totalorder %s36_s30, 6   ;;  %s3357_s25 = sld [smem:[#allocation15_spill]] }
 0x8ff   : > { %s3358_s26 = sld [smem:[#allocation24_spill]] }
 0x900   : > { %s3359_s27 = sld [smem:[#allocation17_spill]]  ;;  %35 = sbr.rel (!%p33_p1) target bundleno = 26 (0x1a), region = 203 }
 0x901   : > { %s3360_s28 = sld [smem:[#allocation18_spill]] }
 0x902   : > { %s3361_s29 = sld [smem:[#allocation20_spill]] }
 0x903   : > { %s3362_s0 = sld [smem:[#allocation21_spill]] }
 0x905   :  { %1896 = vsyncpa [#allocation4], 1 }
 0x906   :  { %1898 = vsyncpa [#allocation4 + $0x1], 1 }
 0x907   :  { %1899 = vsyncpa [#allocation7], 1 }
 0x908   :  { %1901 = vsyncpa [#allocation7 + $0x1], 1 }
 0x909   :  { %1902 = vsyncpa [#allocation5], 1 }
 0x90a   :  { %1904 = vsyncpa [#allocation5 + $0x1], 1 }

</bundles_post_ra>
